<compile_context>
chip_gen: v7x
topology: tpu7x:2x2x1
jax: 0.10.0
libtpu: 0.0.40
codegen_flags: <defaults>
</compile_context>

<pallas_src>
import functools

import jax
import jax.numpy as jnp
from jax.experimental import pallas as pl
from jax.experimental.pallas import tpu as pltpu


def _round_up(x, m):
    return ((x + m - 1) // m) * m


def _vmem_budget_bytes():
    cap = 64 * 1024 * 1024
    try:
        cap = int(pltpu.get_tpu_info().vmem_capacity_bytes)
    except Exception:
        pass  # conservative fallback works on every generation
    return min(100 * 1024 * 1024, (3 * cap) // 4)


def _spec(shape, index_map, buffers=None):
    if buffers is None:
        return pl.BlockSpec(shape, index_map)
    return pl.BlockSpec(shape, index_map, pipeline_mode=pl.Buffered(buffers))


# ---------------------------------------------------------------------------
# In-kernel building blocks
# ---------------------------------------------------------------------------

def _gather_embedding_rows(tok_ref, emb_hbm_ref, emb_vmem, sem):
    """DMA-gather emb_table[tok[r]] -> emb_vmem[r] (tokens live in SMEM)."""
    n_rows = emb_vmem.shape[0]
    copies = [
        pltpu.make_async_copy(
            emb_hbm_ref.at[pl.ds(tok_ref[r], 1), :],
            emb_vmem.at[pl.ds(r, 1), :],
            sem.at[r],
        )
        for r in range(n_rows)
    ]
    for cp in copies:
        cp.start()
    for cp in copies:
        cp.wait()


def _lstm_cell(x_bf16, h_f32, c_f32, wih_ref, whh_ref, b_ref):
    """One LSTM cell, PyTorch gate order [i, f, g, o]; f32 gate math."""
    H = whh_ref.shape[0]
    gates = (
        jnp.dot(x_bf16, wih_ref[...], preferred_element_type=jnp.float32)
        + jnp.dot(h_f32.astype(jnp.bfloat16), whh_ref[...],
                  preferred_element_type=jnp.float32)
        + b_ref[...]
    )
    # H % 128 == 0 -> lane-aligned slices.
    i = jax.nn.sigmoid(gates[:, 0 * H:1 * H])
    f = jax.nn.sigmoid(gates[:, 1 * H:2 * H])
    g = jnp.tanh(gates[:, 2 * H:3 * H])
    o = jax.nn.sigmoid(gates[:, 3 * H:4 * H])
    c_new = f * c_f32 + i * g
    h_new = o * jnp.tanh(c_new)
    return h_new, c_new


def _lstm_step(tok_ref, emb_hbm_ref, h0_ref, c0_ref,
               wih0_ref, whh0_ref, b0_ref, wih1_ref, whh1_ref, b1_ref,
               h_out_ref, c_out_ref, emb_vmem, sem):
    """Embedding gather + 2-layer LSTM step; returns final-layer hidden (bf16)."""
    _gather_embedding_rows(tok_ref, emb_hbm_ref, emb_vmem, sem)
    x = emb_vmem[...].astype(jnp.bfloat16)      # embedding dropout: identity (eval)
    h0n, c0n = _lstm_cell(x, h0_ref[0], c0_ref[0], wih0_ref, whh0_ref, b0_ref)
    # Inter-layer dropout is identity in eval mode.
    h1n, c1n = _lstm_cell(h0n.astype(jnp.bfloat16), h0_ref[1], c0_ref[1],
                          wih1_ref, whh1_ref, b1_ref)
    h_out_ref[0] = h0n
    h_out_ref[1] = h1n
    c_out_ref[0] = c0n
    c_out_ref[1] = c1n
    return h1n.astype(jnp.bfloat16)


# ---------------------------------------------------------------------------
# Kernels
# ---------------------------------------------------------------------------

def _fused_decoder_kernel(tok_ref, emb_hbm_ref, h0_ref, c0_ref,
                          wih0_ref, whh0_ref, b0_ref,
                          wih1_ref, whh1_ref, b1_ref,
                          wfc_ref, bfc_ref,
                          preds_ref, h_out_ref, c_out_ref,
                          emb_vmem, sem):
    # Whole vocab projection fits in VMEM -> grid == (1,), no pl.when needed.
    h1_bf16 = _lstm_step(tok_ref, emb_hbm_ref, h0_ref, c0_ref,
                         wih0_ref, whh0_ref, b0_ref,
                         wih1_ref, whh1_ref, b1_ref,
                         h_out_ref, c_out_ref, emb_vmem, sem)
    preds_ref[...] = (
        jnp.dot(h1_bf16, wfc_ref[...], preferred_element_type=jnp.float32)
        + bfc_ref[...]
    )


def _lstm_only_kernel(tok_ref, emb_hbm_ref, h0_ref, c0_ref,
                      wih0_ref, whh0_ref, b0_ref,
                      wih1_ref, whh1_ref, b1_ref,
                      h1_ref, h_out_ref, c_out_ref,
                      emb_vmem, sem):
    h1_ref[...] = _lstm_step(tok_ref, emb_hbm_ref, h0_ref, c0_ref,
                             wih0_ref, whh0_ref, b0_ref,
                             wih1_ref, whh1_ref, b1_ref,
                             h_out_ref, c_out_ref, emb_vmem, sem)


def _fc_kernel(h1_ref, wfc_ref, bfc_ref, preds_ref):
    # Vocab-projection tile: lane-dense (Bp, tO) store, f32 accumulation.
    preds_ref[...] = (
        jnp.dot(h1_ref[...], wfc_ref[...], preferred_element_type=jnp.float32)
        + bfc_ref[...]
    )


# ---------------------------------------------------------------------------
# Wrapper
# ---------------------------------------------------------------------------

@functools.partial(jax.jit,
                   static_argnames=("output_size", "max_vocab_tile"),
                   donate_argnums=(1, 2))
def decoder_lstm_forward(x_tokens, hidden_state, cell_state, params, *,
                         output_size, max_vocab_tile=None):
    """x_tokens: (B,) int32; hidden_state/cell_state: (L, B, H) f32."""
    emb_table = params["embedding"]                 # (V_in, E) f32
    E = emb_table.shape[1]
    L, B, H = hidden_state.shape
    assert L == 2, "kernel is specialized for num_layers == 2"
    O_pad = params["w_fc_t"].shape[1]
    assert O_pad >= output_size

    # Keep B a multiple of 8 across decode steps for true zero-copy updates.
    Bp = max(8, _round_up(B, 8))
    tok = x_tokens.astype(jnp.int32)
    if Bp != B:
        tok = jnp.pad(tok, (0, Bp - B))             # pad rows gather row 0; sliced off
        hidden_state = jnp.pad(hidden_state, ((0, 0), (0, Bp - B), (0, 0)))
        cell_state = jnp.pad(cell_state, ((0, 0), (0, Bp - B), (0, 0)))

    # ---- VMEM budget & vocab-tile selection (static at trace time) ----------
    budget = _vmem_budget_bytes()
    slack = 4 * 1024 * 1024
    bytes_const = (
        (E + 3 * H) * 4 * H * 2       # bf16 LSTM weights (single-buffered)
        + 2 * 4 * H * 4               # summed biases (f32)
        + 4 * L * Bp * H * 4          # h/c in + out (f32)
        + Bp * E * 4                  # gathered embedding rows (f32 scratch)
        + Bp * H * 2                  # final-layer hidden (bf16)
    )

    def fc_tile_bytes(t, nbuf):
        return nbuf * (H * t * 2 + t * 4 + Bp * t * 4)

    cands = []
    for t in (O_pad, 2048, 1024, 512, 256, 128):
        if t <= O_pad and O_pad % t == 0 and t not in cands:
            cands.append(t)
    if max_vocab_tile is not None:
        cands = [t for t in cands if t <= max_vocab_tile]
    assert cands, "max_vocab_tile must be a multiple of 128 and >= 128"

    fused = (cands[0] == O_pad
             and bytes_const + fc_tile_bytes(O_pad, 1) + slack <= budget)

    lstm_flops = 8 * Bp * H * (E + 3 * H)
    lstm_bytes = (2 * (E + 3 * H) * 4 * H + 4 * 8 * H
                  + 4 * Bp * E + 4 * 4 * L * Bp * H + 2 * Bp * H)
    fc_flops = 2 * Bp * H * O_pad
    fc_bytes = 2 * H * O_pad + 4 * O_pad + 4 * Bp * O_pad + 2 * Bp * H

    lstm_in_specs = [
        pl.BlockSpec(memory_space=pltpu.MemorySpace.SMEM),      # tokens (SMEM)
        pl.BlockSpec(memory_space=pl.ANY),                      # embedding table (HBM)
        _spec((L, Bp, H), lambda i: (0, 0, 0), 1),              # hidden in
        _spec((L, Bp, H), lambda i: (0, 0, 0), 1),              # cell in
        _spec((E, 4 * H), lambda i: (0, 0), 1),                 # W_ih0^T
        _spec((H, 4 * H), lambda i: (0, 0), 1),                 # W_hh0^T
        _spec((1, 4 * H), lambda i: (0, 0), 1),                 # b0
        _spec((H, 4 * H), lambda i: (0, 0), 1),                 # W_ih1^T
        _spec((H, 4 * H), lambda i: (0, 0), 1),                 # W_hh1^T
        _spec((1, 4 * H), lambda i: (0, 0), 1),                 # b1
    ]
    state_out_specs = (
        _spec((L, Bp, H), lambda i: (0, 0, 0), 1),              # hidden out
        _spec((L, Bp, H), lambda i: (0, 0, 0), 1),              # cell out
    )
    lstm_scratch = [pltpu.VMEM((Bp, E), jnp.float32),
                    pltpu.SemaphoreType.DMA((Bp,))]
    lstm_args = (tok, emb_table, hidden_state, cell_state,
                 params["w_ih0_t"], params["w_hh0_t"], params["b0"],
                 params["w_ih1_t"], params["w_hh1_t"], params["b1"])
    # hidden (flat input 2) -> h_out (output 1); cell (3) -> c_out (2), in place.
    aliases = {2: 1, 3: 2}

    if fused:
        grid_spec = pltpu.PrefetchScalarGridSpec(
            num_scalar_prefetch=0,
            grid=(1,),
            in_specs=lstm_in_specs + [
                _spec((H, O_pad), lambda i: (0, 0), 1),         # fc weight (whole)
                _spec((1, O_pad), lambda i: (0, 0), 1),         # fc bias  (whole)
            ],
            out_specs=(_spec((Bp, O_pad), lambda i: (0, 0), 1),) + state_out_specs,
            scratch_shapes=lstm_scratch,
        )
        preds, h_out, c_out = pl.pallas_call(
            _fused_decoder_kernel,
            out_shape=(
                jax.ShapeDtypeStruct((Bp, O_pad), jnp.float32),
                jax.ShapeDtypeStruct((L, Bp, H), jnp.float32),
                jax.ShapeDtypeStruct((L, Bp, H), jnp.float32),
            ),
            grid_spec=grid_spec,
            input_output_aliases=aliases,
            compiler_params=pltpu.CompilerParams(
                dimension_semantics=("arbitrary",),
                vmem_limit_bytes=budget,
            ),
            cost_estimate=pl.CostEstimate(
                flops=lstm_flops + fc_flops,
                transcendentals=10 * Bp * H,
                bytes_accessed=lstm_bytes + fc_bytes,
            ),
        )(*lstm_args, params["w_fc_t"], params["b_fc"])
    else:
        # ---- call 1: tiny LSTM step (grid == 1, single-buffered) -------------
        grid_spec = pltpu.PrefetchScalarGridSpec(
            num_scalar_prefetch=0,
            grid=(1,),
            in_specs=lstm_in_specs,
            out_specs=(_spec((Bp, H), lambda i: (0, 0), 1),) + state_out_specs,
            scratch_shapes=lstm_scratch,
        )
        h1, h_out, c_out = pl.pallas_call(
            _lstm_only_kernel,
            out_shape=(
                jax.ShapeDtypeStruct((Bp, H), jnp.bfloat16),
                jax.ShapeDtypeStruct((L, Bp, H), jnp.float32),
                jax.ShapeDtypeStruct((L, Bp, H), jnp.float32),
            ),
            grid_spec=grid_spec,
            input_output_aliases=aliases,
            compiler_params=pltpu.CompilerParams(
                dimension_semantics=("arbitrary",),
                vmem_limit_bytes=budget,
            ),
            cost_estimate=pl.CostEstimate(
                flops=lstm_flops,
                transcendentals=10 * Bp * H,
                bytes_accessed=lstm_bytes,
            ),
        )(*lstm_args)

        # ---- call 2: vocab projection, O axis megacore-parallel --------------
        tO = cands[-1]
        for t in cands:
            if Bp * H * 2 + fc_tile_bytes(t, 2) + slack <= budget:
                tO = t
                break
        n_o = O_pad // tO
        preds = pl.pallas_call(
            _fc_kernel,
            out_shape=jax.ShapeDtypeStruct((Bp, O_pad), jnp.float32),
            grid_spec=pltpu.PrefetchScalarGridSpec(
                num_scalar_prefetch=0,
                grid=(n_o,),
                in_specs=[
                    _spec((Bp, H), lambda j: (0, 0), 1),        # h1 (resident)
                    _spec((H, tO), lambda j: (0, j)),           # fc weight tile (2-buf)
                    _spec((1, tO), lambda j: (0, j)),           # fc bias tile
                ],
                out_specs=_spec((Bp, tO), lambda j: (0, j)),
            ),
            compiler_params=pltpu.CompilerParams(
                dimension_semantics=("parallel",),
                vmem_limit_bytes=budget,
            ),
            cost_estimate=pl.CostEstimate(
                flops=fc_flops, transcendentals=0, bytes_accessed=fc_bytes,
            ),
        )(h1, params["w_fc_t"], params["b_fc"])

    preds = preds[:B, :output_size]
    if Bp != B:
        h_out = h_out[:, :B]
        c_out = c_out[:, :B]
    return preds, h_out, c_out


# ---------------------------------------------------------------------------
# Params + pure-JAX reference
# ---------------------------------------------------------------------------

def init_params(key, input_size, embedding_size, hidden_size, output_size):
    E, H, O = embedding_size, hidden_size, output_size
    assert E % 128 == 0 and H % 128 == 0, "E and H must be multiples of 128"
    O_pad = _round_up(O, 512)   # bigger padding -> bigger lane-dense fc tiles

    ks = jax.random.split(key, 12)
    scale = 0.1

    def rnd(k, shape):
        return scale * jax.random.normal(k, shape, dtype=jnp.float32)

    # PyTorch layout: W_ih (4H, in), W_hh (4H, H), gate order [i, f, g, o].
    # Stored transposed; biases pre-summed (b_ih + b_hh).
    w_fc_t = rnd(ks[9], (H, O))
    b_fc = rnd(ks[10], (1, O))
    return {
        # f32 table so each gathered row DMA is 32-bit aligned (tiny traffic).
        "embedding": rnd(ks[0], (input_size, E)),
        "w_ih0_t": rnd(ks[1], (E, 4 * H)).astype(jnp.bfloat16),
        "w_hh0_t": rnd(ks[2], (H, 4 * H)).astype(jnp.bfloat16),
        "b0": rnd(ks[3], (1, 4 * H)) + rnd(ks[4], (1, 4 * H)),
        "w_ih1_t": rnd(ks[5], (H, 4 * H)).astype(jnp.bfloat16),
        "w_hh1_t": rnd(ks[6], (H, 4 * H)).astype(jnp.bfloat16),
        "b1": rnd(ks[7], (1, 4 * H)) + rnd(ks[8], (1, 4 * H)),
        "w_fc_t": jnp.pad(w_fc_t, ((0, 0), (0, O_pad - O))).astype(jnp.bfloat16),
        "b_fc": jnp.pad(b_fc, ((0, 0), (0, O_pad - O))),   # bias stays f32
    }


def decoder_lstm_reference(x_tokens, hidden_state, cell_state, params, *, output_size):
    """Pure-JAX reference mirroring the kernel's dtype choices."""
    emb = params["embedding"][x_tokens].astype(jnp.bfloat16)

    def cell(x, h, c, wih, whh, b):
        H = whh.shape[0]
        gates = (jnp.dot(x, wih, preferred_element_type=jnp.float32)
                 + jnp.dot(h.astype(jnp.bfloat16), whh,
                           preferred_element_type=jnp.float32) + b)
        i = jax.nn.sigmoid(gates[:, :H])
        f = jax.nn.sigmoid(gates[:, H:2 * H])
        g = jnp.tanh(gates[:, 2 * H:3 * H])
        o = jax.nn.sigmoid(gates[:, 3 * H:])
        c_new = f * c + i * g
        return o * jnp.tanh(c_new), c_new

    h0n, c0n = cell(emb, hidden_state[0], cell_state[0],
                    params["w_ih0_t"], params["w_hh0_t"], params["b0"])
    h1n, c1n = cell(h0n.astype(jnp.bfloat16), hidden_state[1], cell_state[1],
                    params["w_ih1_t"], params["w_hh1_t"], params["b1"])
    preds = (jnp.dot(h1n.astype(jnp.bfloat16), params["w_fc_t"],
                     preferred_element_type=jnp.float32) + params["b_fc"])
    return preds[:, :output_size], jnp.stack([h0n, h1n]), jnp.stack([c0n, c1n])


if __name__ == "__main__":
    # Small, lane-friendly shapes consistent with the module (num_layers=2).
    B = 8        # batch (full sublane tile)
    E = 128      # embedding_size
    H = 128      # hidden_size
    L = 2        # num_layers
    V_IN = 50    # input_size (decoder vocab)
    V_OUT = 300  # output_size; padded to 512 internally

    key = jax.random.PRNGKey(0)
    k_par, k_x, k_h, k_c = jax.random.split(key, 4)
    params = init_params(k_par, V_IN, E, H, V_OUT)

    x = jax.random.randint(k_x, (B,), 0, V_IN, dtype=jnp.int32)
    h0 = 0.1 * jax.random.normal(k_h, (L, B, H), dtype=jnp.float32)
    c0 = 0.1 * jax.random.normal(k_c, (L, B, H), dtype=jnp.float32)

    # Copies before the donated call consumes h0/c0.
    h0_b = h0 + 0.0
    c0_b = c0 + 0.0
    ref_p, ref_h, ref_c = decoder_lstm_reference(x, h0, c0, params, output_size=V_OUT)

    # Path A: whole vocab projection fits VMEM -> single fused kernel, grid=(1,).
    preds, h_out, c_out = decoder_lstm_forward(x, h0, c0, params, output_size=V_OUT)
    jax.block_until_ready((preds, h_out, c_out))
    assert preds.shape == (B, V_OUT) and preds.dtype == jnp.float32
    assert h_out.shape == (L, B, H) and c_out.shape == (L, B, H)
    assert bool(jnp.all(jnp.isfinite(preds)))
    assert bool(jnp.allclose(preds, ref_p, atol=1e-3, rtol=1e-2))
    assert bool(jnp.allclose(h_out, ref_h, atol=1e-3, rtol=1e-2))
    assert bool(jnp.allclose(c_out, ref_c, atol=1e-3, rtol=1e-2))

    # Path B: force vocab tiling -> LSTM kernel + megacore-parallel fc kernel.
    preds_b, h_out_b, c_out_b = decoder_lstm_forward(
        x, h0_b, c0_b, params, output_size=V_OUT, max_vocab_tile=128)
    jax.block_until_ready((preds_b, h_out_b, c_out_b))
    assert preds_b.shape == (B, V_OUT)
    assert bool(jnp.allclose(preds_b, ref_p, atol=1e-3, rtol=1e-2))
    assert bool(jnp.allclose(h_out_b, ref_h, atol=1e-3, rtol=1e-2))

    print("KERNEL_OK")
</pallas_src>

<mosaic_0001>
module attributes {stable_mosaic.version = 11 : i64} {
  func.func @_fused_decoder_kernel(%arg0: i32, %arg1: memref<8xi32, #tpu.memory_space<smem>>, %arg2: memref<50x128xf32, #tpu.memory_space<any>>, %arg3: memref<2x8x128xf32, #tpu.memory_space<vmem>>, %arg4: memref<2x8x128xf32, #tpu.memory_space<vmem>>, %arg5: memref<128x512xbf16, #tpu.memory_space<vmem>>, %arg6: memref<128x512xbf16, #tpu.memory_space<vmem>>, %arg7: memref<1x512xf32, #tpu.memory_space<vmem>>, %arg8: memref<128x512xbf16, #tpu.memory_space<vmem>>, %arg9: memref<128x512xbf16, #tpu.memory_space<vmem>>, %arg10: memref<1x512xf32, #tpu.memory_space<vmem>>, %arg11: memref<128x512xbf16, #tpu.memory_space<vmem>>, %arg12: memref<1x512xf32, #tpu.memory_space<vmem>>, %arg13: memref<8x512xf32, #tpu.memory_space<vmem>>, %arg14: memref<2x8x128xf32, #tpu.memory_space<vmem>>, %arg15: memref<2x8x128xf32, #tpu.memory_space<vmem>>, %arg16: memref<8x128xf32, #tpu.memory_space<vmem>>, %arg17: memref<8x!tpu.dma_semaphore, #tpu.memory_space<semaphore_mem>>) attributes {dimension_semantics = [#tpu.dimension_semantics<arbitrary>], iteration_bounds = array<i64: 1>, scalar_prefetch = 0 : i64, scratch_operands = 2 : i64, tpu.core_type = #tpu.core_type<tc>, window_params = [{transform_indices = @transform_0, window_bounds = array<i64: 8>}, {}, {pipeline_mode = #tpu.pipeline_mode<synchronous>, transform_indices = @transform_2, window_bounds = array<i64: 2, 8, 128>}, {pipeline_mode = #tpu.pipeline_mode<synchronous>, transform_indices = @transform_3, window_bounds = array<i64: 2, 8, 128>}, {pipeline_mode = #tpu.pipeline_mode<synchronous>, transform_indices = @transform_4, window_bounds = array<i64: 128, 512>}, {pipeline_mode = #tpu.pipeline_mode<synchronous>, transform_indices = @transform_5, window_bounds = array<i64: 128, 512>}, {pipeline_mode = #tpu.pipeline_mode<synchronous>, transform_indices = @transform_6, window_bounds = array<i64: 1, 512>}, {pipeline_mode = #tpu.pipeline_mode<synchronous>, transform_indices = @transform_7, window_bounds = array<i64: 128, 512>}, {pipeline_mode = #tpu.pipeline_mode<synchronous>, transform_indices = @transform_8, window_bounds = array<i64: 128, 512>}, {pipeline_mode = #tpu.pipeline_mode<synchronous>, transform_indices = @transform_9, window_bounds = array<i64: 1, 512>}, {pipeline_mode = #tpu.pipeline_mode<synchronous>, transform_indices = @transform_10, window_bounds = array<i64: 128, 512>}, {pipeline_mode = #tpu.pipeline_mode<synchronous>, transform_indices = @transform_11, window_bounds = array<i64: 1, 512>}, {pipeline_mode = #tpu.pipeline_mode<synchronous>, transform_indices = @transform_12, window_bounds = array<i64: 8, 512>}, {pipeline_mode = #tpu.pipeline_mode<synchronous>, transform_indices = @transform_13, window_bounds = array<i64: 2, 8, 128>}, {pipeline_mode = #tpu.pipeline_mode<synchronous>, transform_indices = @transform_14, window_bounds = array<i64: 2, 8, 128>}]} {
    %c0 = arith.constant 0 : index
    %0 = memref.load %arg1[%c0] : memref<8xi32, #tpu.memory_space<smem>>
    %c1 = arith.constant 1 : index
    %1 = memref.load %arg1[%c1] : memref<8xi32, #tpu.memory_space<smem>>
    %c2 = arith.constant 2 : index
    %2 = memref.load %arg1[%c2] : memref<8xi32, #tpu.memory_space<smem>>
    %c3 = arith.constant 3 : index
    %3 = memref.load %arg1[%c3] : memref<8xi32, #tpu.memory_space<smem>>
    %c4 = arith.constant 4 : index
    %4 = memref.load %arg1[%c4] : memref<8xi32, #tpu.memory_space<smem>>
    %c5 = arith.constant 5 : index
    %5 = memref.load %arg1[%c5] : memref<8xi32, #tpu.memory_space<smem>>
    %c6 = arith.constant 6 : index
    %6 = memref.load %arg1[%c6] : memref<8xi32, #tpu.memory_space<smem>>
    %c7 = arith.constant 7 : index
    %7 = memref.load %arg1[%c7] : memref<8xi32, #tpu.memory_space<smem>>
    %c0_i32 = arith.constant 0 : i32
    %c0_i32_0 = arith.constant 0 : i32
    %8 = tpu.memref_slice %arg2[%0, %c0_i32_0] : memref<50x128xf32, #tpu.memory_space<any>> -> memref<1x128xf32, #tpu.memory_space<any>>
    %c0_i32_1 = arith.constant 0 : i32
    %c0_i32_2 = arith.constant 0 : i32
    %9 = tpu.memref_slice %arg16[%c0_i32_1, %c0_i32_2] : memref<8x128xf32, #tpu.memory_space<vmem>> -> memref<1x128xf32, #tpu.memory_space<vmem>>
    %10 = tpu.memref_slice %arg17[%c0_i32] : memref<8x!tpu.dma_semaphore, #tpu.memory_space<semaphore_mem>> -> memref<1x!tpu.dma_semaphore, #tpu.memory_space<semaphore_mem>>
    %11 = tpu.memref_squeeze %10 : memref<1x!tpu.dma_semaphore, #tpu.memory_space<semaphore_mem>> -> memref<!tpu.dma_semaphore, #tpu.memory_space<semaphore_mem>>
    tpu.enqueue_dma source(%8 : memref<1x128xf32, #tpu.memory_space<any>>) target(%9 : memref<1x128xf32, #tpu.memory_space<vmem>>) target_semaphore(%11 : memref<!tpu.dma_semaphore, #tpu.memory_space<semaphore_mem>>)
    %c1_i32 = arith.constant 1 : i32
    %c0_i32_3 = arith.constant 0 : i32
    %12 = tpu.memref_slice %arg2[%1, %c0_i32_3] : memref<50x128xf32, #tpu.memory_space<any>> -> memref<1x128xf32, #tpu.memory_space<any>>
    %c1_i32_4 = arith.constant 1 : i32
    %c0_i32_5 = arith.constant 0 : i32
    %13 = tpu.memref_slice %arg16[%c1_i32_4, %c0_i32_5] : memref<8x128xf32, #tpu.memory_space<vmem>> -> memref<1x128xf32, #tpu.memory_space<vmem>>
    %14 = tpu.memref_slice %arg17[%c1_i32] : memref<8x!tpu.dma_semaphore, #tpu.memory_space<semaphore_mem>> -> memref<1x!tpu.dma_semaphore, #tpu.memory_space<semaphore_mem>>
    %15 = tpu.memref_squeeze %14 : memref<1x!tpu.dma_semaphore, #tpu.memory_space<semaphore_mem>> -> memref<!tpu.dma_semaphore, #tpu.memory_space<semaphore_mem>>
    tpu.enqueue_dma source(%12 : memref<1x128xf32, #tpu.memory_space<any>>) target(%13 : memref<1x128xf32, #tpu.memory_space<vmem>>) target_semaphore(%15 : memref<!tpu.dma_semaphore, #tpu.memory_space<semaphore_mem>>)
    %c2_i32 = arith.constant 2 : i32
    %c0_i32_6 = arith.constant 0 : i32
    %16 = tpu.memref_slice %arg2[%2, %c0_i32_6] : memref<50x128xf32, #tpu.memory_space<any>> -> memref<1x128xf32, #tpu.memory_space<any>>
    %c2_i32_7 = arith.constant 2 : i32
    %c0_i32_8 = arith.constant 0 : i32
    %17 = tpu.memref_slice %arg16[%c2_i32_7, %c0_i32_8] : memref<8x128xf32, #tpu.memory_space<vmem>> -> memref<1x128xf32, #tpu.memory_space<vmem>>
    %18 = tpu.memref_slice %arg17[%c2_i32] : memref<8x!tpu.dma_semaphore, #tpu.memory_space<semaphore_mem>> -> memref<1x!tpu.dma_semaphore, #tpu.memory_space<semaphore_mem>>
    %19 = tpu.memref_squeeze %18 : memref<1x!tpu.dma_semaphore, #tpu.memory_space<semaphore_mem>> -> memref<!tpu.dma_semaphore, #tpu.memory_space<semaphore_mem>>
    tpu.enqueue_dma source(%16 : memref<1x128xf32, #tpu.memory_space<any>>) target(%17 : memref<1x128xf32, #tpu.memory_space<vmem>>) target_semaphore(%19 : memref<!tpu.dma_semaphore, #tpu.memory_space<semaphore_mem>>)
    %c3_i32 = arith.constant 3 : i32
    %c0_i32_9 = arith.constant 0 : i32
    %20 = tpu.memref_slice %arg2[%3, %c0_i32_9] : memref<50x128xf32, #tpu.memory_space<any>> -> memref<1x128xf32, #tpu.memory_space<any>>
    %c3_i32_10 = arith.constant 3 : i32
    %c0_i32_11 = arith.constant 0 : i32
    %21 = tpu.memref_slice %arg16[%c3_i32_10, %c0_i32_11] : memref<8x128xf32, #tpu.memory_space<vmem>> -> memref<1x128xf32, #tpu.memory_space<vmem>>
    %22 = tpu.memref_slice %arg17[%c3_i32] : memref<8x!tpu.dma_semaphore, #tpu.memory_space<semaphore_mem>> -> memref<1x!tpu.dma_semaphore, #tpu.memory_space<semaphore_mem>>
    %23 = tpu.memref_squeeze %22 : memref<1x!tpu.dma_semaphore, #tpu.memory_space<semaphore_mem>> -> memref<!tpu.dma_semaphore, #tpu.memory_space<semaphore_mem>>
    tpu.enqueue_dma source(%20 : memref<1x128xf32, #tpu.memory_space<any>>) target(%21 : memref<1x128xf32, #tpu.memory_space<vmem>>) target_semaphore(%23 : memref<!tpu.dma_semaphore, #tpu.memory_space<semaphore_mem>>)
    %c4_i32 = arith.constant 4 : i32
    %c0_i32_12 = arith.constant 0 : i32
    %24 = tpu.memref_slice %arg2[%4, %c0_i32_12] : memref<50x128xf32, #tpu.memory_space<any>> -> memref<1x128xf32, #tpu.memory_space<any>>
    %c4_i32_13 = arith.constant 4 : i32
    %c0_i32_14 = arith.constant 0 : i32
    %25 = tpu.memref_slice %arg16[%c4_i32_13, %c0_i32_14] : memref<8x128xf32, #tpu.memory_space<vmem>> -> memref<1x128xf32, #tpu.memory_space<vmem>>
    %26 = tpu.memref_slice %arg17[%c4_i32] : memref<8x!tpu.dma_semaphore, #tpu.memory_space<semaphore_mem>> -> memref<1x!tpu.dma_semaphore, #tpu.memory_space<semaphore_mem>>
    %27 = tpu.memref_squeeze %26 : memref<1x!tpu.dma_semaphore, #tpu.memory_space<semaphore_mem>> -> memref<!tpu.dma_semaphore, #tpu.memory_space<semaphore_mem>>
    tpu.enqueue_dma source(%24 : memref<1x128xf32, #tpu.memory_space<any>>) target(%25 : memref<1x128xf32, #tpu.memory_space<vmem>>) target_semaphore(%27 : memref<!tpu.dma_semaphore, #tpu.memory_space<semaphore_mem>>)
    %c5_i32 = arith.constant 5 : i32
    %c0_i32_15 = arith.constant 0 : i32
    %28 = tpu.memref_slice %arg2[%5, %c0_i32_15] : memref<50x128xf32, #tpu.memory_space<any>> -> memref<1x128xf32, #tpu.memory_space<any>>
    %c5_i32_16 = arith.constant 5 : i32
    %c0_i32_17 = arith.constant 0 : i32
    %29 = tpu.memref_slice %arg16[%c5_i32_16, %c0_i32_17] : memref<8x128xf32, #tpu.memory_space<vmem>> -> memref<1x128xf32, #tpu.memory_space<vmem>>
    %30 = tpu.memref_slice %arg17[%c5_i32] : memref<8x!tpu.dma_semaphore, #tpu.memory_space<semaphore_mem>> -> memref<1x!tpu.dma_semaphore, #tpu.memory_space<semaphore_mem>>
    %31 = tpu.memref_squeeze %30 : memref<1x!tpu.dma_semaphore, #tpu.memory_space<semaphore_mem>> -> memref<!tpu.dma_semaphore, #tpu.memory_space<semaphore_mem>>
    tpu.enqueue_dma source(%28 : memref<1x128xf32, #tpu.memory_space<any>>) target(%29 : memref<1x128xf32, #tpu.memory_space<vmem>>) target_semaphore(%31 : memref<!tpu.dma_semaphore, #tpu.memory_space<semaphore_mem>>)
    %c6_i32 = arith.constant 6 : i32
    %c0_i32_18 = arith.constant 0 : i32
    %32 = tpu.memref_slice %arg2[%6, %c0_i32_18] : memref<50x128xf32, #tpu.memory_space<any>> -> memref<1x128xf32, #tpu.memory_space<any>>
    %c6_i32_19 = arith.constant 6 : i32
    %c0_i32_20 = arith.constant 0 : i32
    %33 = tpu.memref_slice %arg16[%c6_i32_19, %c0_i32_20] : memref<8x128xf32, #tpu.memory_space<vmem>> -> memref<1x128xf32, #tpu.memory_space<vmem>>
    %34 = tpu.memref_slice %arg17[%c6_i32] : memref<8x!tpu.dma_semaphore, #tpu.memory_space<semaphore_mem>> -> memref<1x!tpu.dma_semaphore, #tpu.memory_space<semaphore_mem>>
    %35 = tpu.memref_squeeze %34 : memref<1x!tpu.dma_semaphore, #tpu.memory_space<semaphore_mem>> -> memref<!tpu.dma_semaphore, #tpu.memory_space<semaphore_mem>>
    tpu.enqueue_dma source(%32 : memref<1x128xf32, #tpu.memory_space<any>>) target(%33 : memref<1x128xf32, #tpu.memory_space<vmem>>) target_semaphore(%35 : memref<!tpu.dma_semaphore, #tpu.memory_space<semaphore_mem>>)
    %c7_i32 = arith.constant 7 : i32
    %c0_i32_21 = arith.constant 0 : i32
    %36 = tpu.memref_slice %arg2[%7, %c0_i32_21] : memref<50x128xf32, #tpu.memory_space<any>> -> memref<1x128xf32, #tpu.memory_space<any>>
    %c7_i32_22 = arith.constant 7 : i32
    %c0_i32_23 = arith.constant 0 : i32
    %37 = tpu.memref_slice %arg16[%c7_i32_22, %c0_i32_23] : memref<8x128xf32, #tpu.memory_space<vmem>> -> memref<1x128xf32, #tpu.memory_space<vmem>>
    %38 = tpu.memref_slice %arg17[%c7_i32] : memref<8x!tpu.dma_semaphore, #tpu.memory_space<semaphore_mem>> -> memref<1x!tpu.dma_semaphore, #tpu.memory_space<semaphore_mem>>
    %39 = tpu.memref_squeeze %38 : memref<1x!tpu.dma_semaphore, #tpu.memory_space<semaphore_mem>> -> memref<!tpu.dma_semaphore, #tpu.memory_space<semaphore_mem>>
    tpu.enqueue_dma source(%36 : memref<1x128xf32, #tpu.memory_space<any>>) target(%37 : memref<1x128xf32, #tpu.memory_space<vmem>>) target_semaphore(%39 : memref<!tpu.dma_semaphore, #tpu.memory_space<semaphore_mem>>)
    %c0_i32_24 = arith.constant 0 : i32
    %c0_i32_25 = arith.constant 0 : i32
    %40 = tpu.memref_slice %arg2[%0, %c0_i32_25] : memref<50x128xf32, #tpu.memory_space<any>> -> memref<1x128xf32, #tpu.memory_space<any>>
    %c0_i32_26 = arith.constant 0 : i32
    %c0_i32_27 = arith.constant 0 : i32
    %41 = tpu.memref_slice %arg16[%c0_i32_26, %c0_i32_27] : memref<8x128xf32, #tpu.memory_space<vmem>> -> memref<1x128xf32, #tpu.memory_space<vmem>>
    %42 = tpu.memref_slice %arg17[%c0_i32_24] : memref<8x!tpu.dma_semaphore, #tpu.memory_space<semaphore_mem>> -> memref<1x!tpu.dma_semaphore, #tpu.memory_space<semaphore_mem>>
    %43 = tpu.memref_squeeze %42 : memref<1x!tpu.dma_semaphore, #tpu.memory_space<semaphore_mem>> -> memref<!tpu.dma_semaphore, #tpu.memory_space<semaphore_mem>>
    tpu.wait_dma2 semaphore(%43 : memref<!tpu.dma_semaphore, #tpu.memory_space<semaphore_mem>>) src(%40 : memref<1x128xf32, #tpu.memory_space<any>>) dst(%41 : memref<1x128xf32, #tpu.memory_space<vmem>>)
    %c1_i32_28 = arith.constant 1 : i32
    %c0_i32_29 = arith.constant 0 : i32
    %44 = tpu.memref_slice %arg2[%1, %c0_i32_29] : memref<50x128xf32, #tpu.memory_space<any>> -> memref<1x128xf32, #tpu.memory_space<any>>
    %c1_i32_30 = arith.constant 1 : i32
    %c0_i32_31 = arith.constant 0 : i32
    %45 = tpu.memref_slice %arg16[%c1_i32_30, %c0_i32_31] : memref<8x128xf32, #tpu.memory_space<vmem>> -> memref<1x128xf32, #tpu.memory_space<vmem>>
    %46 = tpu.memref_slice %arg17[%c1_i32_28] : memref<8x!tpu.dma_semaphore, #tpu.memory_space<semaphore_mem>> -> memref<1x!tpu.dma_semaphore, #tpu.memory_space<semaphore_mem>>
    %47 = tpu.memref_squeeze %46 : memref<1x!tpu.dma_semaphore, #tpu.memory_space<semaphore_mem>> -> memref<!tpu.dma_semaphore, #tpu.memory_space<semaphore_mem>>
    tpu.wait_dma2 semaphore(%47 : memref<!tpu.dma_semaphore, #tpu.memory_space<semaphore_mem>>) src(%44 : memref<1x128xf32, #tpu.memory_space<any>>) dst(%45 : memref<1x128xf32, #tpu.memory_space<vmem>>)
    %c2_i32_32 = arith.constant 2 : i32
    %c0_i32_33 = arith.constant 0 : i32
    %48 = tpu.memref_slice %arg2[%2, %c0_i32_33] : memref<50x128xf32, #tpu.memory_space<any>> -> memref<1x128xf32, #tpu.memory_space<any>>
    %c2_i32_34 = arith.constant 2 : i32
    %c0_i32_35 = arith.constant 0 : i32
    %49 = tpu.memref_slice %arg16[%c2_i32_34, %c0_i32_35] : memref<8x128xf32, #tpu.memory_space<vmem>> -> memref<1x128xf32, #tpu.memory_space<vmem>>
    %50 = tpu.memref_slice %arg17[%c2_i32_32] : memref<8x!tpu.dma_semaphore, #tpu.memory_space<semaphore_mem>> -> memref<1x!tpu.dma_semaphore, #tpu.memory_space<semaphore_mem>>
    %51 = tpu.memref_squeeze %50 : memref<1x!tpu.dma_semaphore, #tpu.memory_space<semaphore_mem>> -> memref<!tpu.dma_semaphore, #tpu.memory_space<semaphore_mem>>
    tpu.wait_dma2 semaphore(%51 : memref<!tpu.dma_semaphore, #tpu.memory_space<semaphore_mem>>) src(%48 : memref<1x128xf32, #tpu.memory_space<any>>) dst(%49 : memref<1x128xf32, #tpu.memory_space<vmem>>)
    %c3_i32_36 = arith.constant 3 : i32
    %c0_i32_37 = arith.constant 0 : i32
    %52 = tpu.memref_slice %arg2[%3, %c0_i32_37] : memref<50x128xf32, #tpu.memory_space<any>> -> memref<1x128xf32, #tpu.memory_space<any>>
    %c3_i32_38 = arith.constant 3 : i32
    %c0_i32_39 = arith.constant 0 : i32
    %53 = tpu.memref_slice %arg16[%c3_i32_38, %c0_i32_39] : memref<8x128xf32, #tpu.memory_space<vmem>> -> memref<1x128xf32, #tpu.memory_space<vmem>>
    %54 = tpu.memref_slice %arg17[%c3_i32_36] : memref<8x!tpu.dma_semaphore, #tpu.memory_space<semaphore_mem>> -> memref<1x!tpu.dma_semaphore, #tpu.memory_space<semaphore_mem>>
    %55 = tpu.memref_squeeze %54 : memref<1x!tpu.dma_semaphore, #tpu.memory_space<semaphore_mem>> -> memref<!tpu.dma_semaphore, #tpu.memory_space<semaphore_mem>>
    tpu.wait_dma2 semaphore(%55 : memref<!tpu.dma_semaphore, #tpu.memory_space<semaphore_mem>>) src(%52 : memref<1x128xf32, #tpu.memory_space<any>>) dst(%53 : memref<1x128xf32, #tpu.memory_space<vmem>>)
    %c4_i32_40 = arith.constant 4 : i32
    %c0_i32_41 = arith.constant 0 : i32
    %56 = tpu.memref_slice %arg2[%4, %c0_i32_41] : memref<50x128xf32, #tpu.memory_space<any>> -> memref<1x128xf32, #tpu.memory_space<any>>
    %c4_i32_42 = arith.constant 4 : i32
    %c0_i32_43 = arith.constant 0 : i32
    %57 = tpu.memref_slice %arg16[%c4_i32_42, %c0_i32_43] : memref<8x128xf32, #tpu.memory_space<vmem>> -> memref<1x128xf32, #tpu.memory_space<vmem>>
    %58 = tpu.memref_slice %arg17[%c4_i32_40] : memref<8x!tpu.dma_semaphore, #tpu.memory_space<semaphore_mem>> -> memref<1x!tpu.dma_semaphore, #tpu.memory_space<semaphore_mem>>
    %59 = tpu.memref_squeeze %58 : memref<1x!tpu.dma_semaphore, #tpu.memory_space<semaphore_mem>> -> memref<!tpu.dma_semaphore, #tpu.memory_space<semaphore_mem>>
    tpu.wait_dma2 semaphore(%59 : memref<!tpu.dma_semaphore, #tpu.memory_space<semaphore_mem>>) src(%56 : memref<1x128xf32, #tpu.memory_space<any>>) dst(%57 : memref<1x128xf32, #tpu.memory_space<vmem>>)
    %c5_i32_44 = arith.constant 5 : i32
    %c0_i32_45 = arith.constant 0 : i32
    %60 = tpu.memref_slice %arg2[%5, %c0_i32_45] : memref<50x128xf32, #tpu.memory_space<any>> -> memref<1x128xf32, #tpu.memory_space<any>>
    %c5_i32_46 = arith.constant 5 : i32
    %c0_i32_47 = arith.constant 0 : i32
    %61 = tpu.memref_slice %arg16[%c5_i32_46, %c0_i32_47] : memref<8x128xf32, #tpu.memory_space<vmem>> -> memref<1x128xf32, #tpu.memory_space<vmem>>
    %62 = tpu.memref_slice %arg17[%c5_i32_44] : memref<8x!tpu.dma_semaphore, #tpu.memory_space<semaphore_mem>> -> memref<1x!tpu.dma_semaphore, #tpu.memory_space<semaphore_mem>>
    %63 = tpu.memref_squeeze %62 : memref<1x!tpu.dma_semaphore, #tpu.memory_space<semaphore_mem>> -> memref<!tpu.dma_semaphore, #tpu.memory_space<semaphore_mem>>
    tpu.wait_dma2 semaphore(%63 : memref<!tpu.dma_semaphore, #tpu.memory_space<semaphore_mem>>) src(%60 : memref<1x128xf32, #tpu.memory_space<any>>) dst(%61 : memref<1x128xf32, #tpu.memory_space<vmem>>)
    %c6_i32_48 = arith.constant 6 : i32
    %c0_i32_49 = arith.constant 0 : i32
    %64 = tpu.memref_slice %arg2[%6, %c0_i32_49] : memref<50x128xf32, #tpu.memory_space<any>> -> memref<1x128xf32, #tpu.memory_space<any>>
    %c6_i32_50 = arith.constant 6 : i32
    %c0_i32_51 = arith.constant 0 : i32
    %65 = tpu.memref_slice %arg16[%c6_i32_50, %c0_i32_51] : memref<8x128xf32, #tpu.memory_space<vmem>> -> memref<1x128xf32, #tpu.memory_space<vmem>>
    %66 = tpu.memref_slice %arg17[%c6_i32_48] : memref<8x!tpu.dma_semaphore, #tpu.memory_space<semaphore_mem>> -> memref<1x!tpu.dma_semaphore, #tpu.memory_space<semaphore_mem>>
    %67 = tpu.memref_squeeze %66 : memref<1x!tpu.dma_semaphore, #tpu.memory_space<semaphore_mem>> -> memref<!tpu.dma_semaphore, #tpu.memory_space<semaphore_mem>>
    tpu.wait_dma2 semaphore(%67 : memref<!tpu.dma_semaphore, #tpu.memory_space<semaphore_mem>>) src(%64 : memref<1x128xf32, #tpu.memory_space<any>>) dst(%65 : memref<1x128xf32, #tpu.memory_space<vmem>>)
    %c7_i32_52 = arith.constant 7 : i32
    %c0_i32_53 = arith.constant 0 : i32
    %68 = tpu.memref_slice %arg2[%7, %c0_i32_53] : memref<50x128xf32, #tpu.memory_space<any>> -> memref<1x128xf32, #tpu.memory_space<any>>
    %c7_i32_54 = arith.constant 7 : i32
    %c0_i32_55 = arith.constant 0 : i32
    %69 = tpu.memref_slice %arg16[%c7_i32_54, %c0_i32_55] : memref<8x128xf32, #tpu.memory_space<vmem>> -> memref<1x128xf32, #tpu.memory_space<vmem>>
    %70 = tpu.memref_slice %arg17[%c7_i32_52] : memref<8x!tpu.dma_semaphore, #tpu.memory_space<semaphore_mem>> -> memref<1x!tpu.dma_semaphore, #tpu.memory_space<semaphore_mem>>
    %71 = tpu.memref_squeeze %70 : memref<1x!tpu.dma_semaphore, #tpu.memory_space<semaphore_mem>> -> memref<!tpu.dma_semaphore, #tpu.memory_space<semaphore_mem>>
    tpu.wait_dma2 semaphore(%71 : memref<!tpu.dma_semaphore, #tpu.memory_space<semaphore_mem>>) src(%68 : memref<1x128xf32, #tpu.memory_space<any>>) dst(%69 : memref<1x128xf32, #tpu.memory_space<vmem>>)
    %c0_56 = arith.constant 0 : index
    %c0_57 = arith.constant 0 : index
    %72 = vector.load %arg16[%c0_56, %c0_57] : memref<8x128xf32, #tpu.memory_space<vmem>>, vector<8x128xf32>
    %73 = arith.truncf %72 : vector<8x128xf32> to vector<8x128xbf16>
    %c0_58 = arith.constant 0 : index
    %c0_59 = arith.constant 0 : index
    %c0_60 = arith.constant 0 : index
    %74 = vector.load %arg3[%c0_58, %c0_59, %c0_60] : memref<2x8x128xf32, #tpu.memory_space<vmem>>, vector<1x8x128xf32>
    %75 = vector.shape_cast %74 : vector<1x8x128xf32> to vector<8x128xf32>
    %c0_61 = arith.constant 0 : index
    %c0_62 = arith.constant 0 : index
    %c0_63 = arith.constant 0 : index
    %76 = vector.load %arg4[%c0_61, %c0_62, %c0_63] : memref<2x8x128xf32, #tpu.memory_space<vmem>>, vector<1x8x128xf32>
    %77 = vector.shape_cast %76 : vector<1x8x128xf32> to vector<8x128xf32>
    %c0_64 = arith.constant 0 : index
    %c0_65 = arith.constant 0 : index
    %78 = vector.load %arg5[%c0_64, %c0_65] : memref<128x512xbf16, #tpu.memory_space<vmem>>, vector<128x512xbf16>
    %cst = arith.constant dense<0.000000e+00> : vector<8x512xf32>
    %79 = tpu.matmul %73, %78, %cst {dimension_numbers = #tpu.dot_dimension_numbers<[1], [0], [0], [1], [0, 0, 1, 1], [], []>} : vector<8x128xbf16>, vector<128x512xbf16>, vector<8x512xf32> -> vector<8x512xf32>
    %80 = arith.truncf %75 : vector<8x128xf32> to vector<8x128xbf16>
    %c0_66 = arith.constant 0 : index
    %c0_67 = arith.constant 0 : index
    %81 = vector.load %arg6[%c0_66, %c0_67] : memref<128x512xbf16, #tpu.memory_space<vmem>>, vector<128x512xbf16>
    %cst_68 = arith.constant dense<0.000000e+00> : vector<8x512xf32>
    %82 = tpu.matmul %80, %81, %cst_68 {dimension_numbers = #tpu.dot_dimension_numbers<[1], [0], [0], [1], [0, 0, 1, 1], [], []>} : vector<8x128xbf16>, vector<128x512xbf16>, vector<8x512xf32> -> vector<8x512xf32>
    %83 = arith.addf %79, %82 : vector<8x512xf32>
    %c0_69 = arith.constant 0 : index
    %c0_70 = arith.constant 0 : index
    %84 = vector.load %arg7[%c0_69, %c0_70] : memref<1x512xf32, #tpu.memory_space<vmem>>, vector<1x512xf32>
    %85 = vector.broadcast %84 : vector<1x512xf32> to vector<8x512xf32>
    %86 = arith.addf %83, %85 : vector<8x512xf32>
    %87 = vector.extract_strided_slice %86 {offsets = [0, 0], sizes = [8, 128], strides = [1, 1]} : vector<8x512xf32> to vector<8x128xf32>
    %88 = arith.negf %87 : vector<8x128xf32>
    %89 = math.exp %88 : vector<8x128xf32>
    %cst_71 = arith.constant 1.000000e+00 : f32
    %90 = vector.broadcast %cst_71 : f32 to vector<8x128xf32>
    %91 = arith.addf %90, %89 : vector<8x128xf32>
    %92 = arith.divf %90, %91 : vector<8x128xf32>
    %93 = vector.extract_strided_slice %86 {offsets = [0, 128], sizes = [8, 128], strides = [1, 1]} : vector<8x512xf32> to vector<8x128xf32>
    %94 = arith.negf %93 : vector<8x128xf32>
    %95 = math.exp %94 : vector<8x128xf32>
    %cst_72 = arith.constant 1.000000e+00 : f32
    %96 = vector.broadcast %cst_72 : f32 to vector<8x128xf32>
    %97 = arith.addf %96, %95 : vector<8x128xf32>
    %98 = arith.divf %96, %97 : vector<8x128xf32>
    %99 = vector.extract_strided_slice %86 {offsets = [0, 256], sizes = [8, 128], strides = [1, 1]} : vector<8x512xf32> to vector<8x128xf32>
    %100 = math.tanh %99 : vector<8x128xf32>
    %101 = vector.extract_strided_slice %86 {offsets = [0, 384], sizes = [8, 128], strides = [1, 1]} : vector<8x512xf32> to vector<8x128xf32>
    %102 = arith.negf %101 : vector<8x128xf32>
    %103 = math.exp %102 : vector<8x128xf32>
    %cst_73 = arith.constant 1.000000e+00 : f32
    %104 = vector.broadcast %cst_73 : f32 to vector<8x128xf32>
    %105 = arith.addf %104, %103 : vector<8x128xf32>
    %106 = arith.divf %104, %105 : vector<8x128xf32>
    %107 = arith.mulf %98, %77 : vector<8x128xf32>
    %108 = arith.mulf %92, %100 : vector<8x128xf32>
    %109 = arith.addf %107, %108 : vector<8x128xf32>
    %110 = math.tanh %109 : vector<8x128xf32>
    %111 = arith.mulf %106, %110 : vector<8x128xf32>
    %112 = arith.truncf %111 : vector<8x128xf32> to vector<8x128xbf16>
    %c1_74 = arith.constant 1 : index
    %c0_75 = arith.constant 0 : index
    %c0_76 = arith.constant 0 : index
    %113 = vector.load %arg3[%c1_74, %c0_75, %c0_76] : memref<2x8x128xf32, #tpu.memory_space<vmem>>, vector<1x8x128xf32>
    %114 = vector.shape_cast %113 : vector<1x8x128xf32> to vector<8x128xf32>
    %c1_77 = arith.constant 1 : index
    %c0_78 = arith.constant 0 : index
    %c0_79 = arith.constant 0 : index
    %115 = vector.load %arg4[%c1_77, %c0_78, %c0_79] : memref<2x8x128xf32, #tpu.memory_space<vmem>>, vector<1x8x128xf32>
    %116 = vector.shape_cast %115 : vector<1x8x128xf32> to vector<8x128xf32>
    %c0_80 = arith.constant 0 : index
    %c0_81 = arith.constant 0 : index
    %117 = vector.load %arg8[%c0_80, %c0_81] : memref<128x512xbf16, #tpu.memory_space<vmem>>, vector<128x512xbf16>
    %cst_82 = arith.constant dense<0.000000e+00> : vector<8x512xf32>
    %118 = tpu.matmul %112, %117, %cst_82 {dimension_numbers = #tpu.dot_dimension_numbers<[1], [0], [0], [1], [0, 0, 1, 1], [], []>} : vector<8x128xbf16>, vector<128x512xbf16>, vector<8x512xf32> -> vector<8x512xf32>
    %119 = arith.truncf %114 : vector<8x128xf32> to vector<8x128xbf16>
    %c0_83 = arith.constant 0 : index
    %c0_84 = arith.constant 0 : index
    %120 = vector.load %arg9[%c0_83, %c0_84] : memref<128x512xbf16, #tpu.memory_space<vmem>>, vector<128x512xbf16>
    %cst_85 = arith.constant dense<0.000000e+00> : vector<8x512xf32>
    %121 = tpu.matmul %119, %120, %cst_85 {dimension_numbers = #tpu.dot_dimension_numbers<[1], [0], [0], [1], [0, 0, 1, 1], [], []>} : vector<8x128xbf16>, vector<128x512xbf16>, vector<8x512xf32> -> vector<8x512xf32>
    %122 = arith.addf %118, %121 : vector<8x512xf32>
    %c0_86 = arith.constant 0 : index
    %c0_87 = arith.constant 0 : index
    %123 = vector.load %arg10[%c0_86, %c0_87] : memref<1x512xf32, #tpu.memory_space<vmem>>, vector<1x512xf32>
    %124 = vector.broadcast %123 : vector<1x512xf32> to vector<8x512xf32>
    %125 = arith.addf %122, %124 : vector<8x512xf32>
    %126 = vector.extract_strided_slice %125 {offsets = [0, 0], sizes = [8, 128], strides = [1, 1]} : vector<8x512xf32> to vector<8x128xf32>
    %127 = arith.negf %126 : vector<8x128xf32>
    %128 = math.exp %127 : vector<8x128xf32>
    %cst_88 = arith.constant 1.000000e+00 : f32
    %129 = vector.broadcast %cst_88 : f32 to vector<8x128xf32>
    %130 = arith.addf %129, %128 : vector<8x128xf32>
    %131 = arith.divf %129, %130 : vector<8x128xf32>
    %132 = vector.extract_strided_slice %125 {offsets = [0, 128], sizes = [8, 128], strides = [1, 1]} : vector<8x512xf32> to vector<8x128xf32>
    %133 = arith.negf %132 : vector<8x128xf32>
    %134 = math.exp %133 : vector<8x128xf32>
    %cst_89 = arith.constant 1.000000e+00 : f32
    %135 = vector.broadcast %cst_89 : f32 to vector<8x128xf32>
    %136 = arith.addf %135, %134 : vector<8x128xf32>
    %137 = arith.divf %135, %136 : vector<8x128xf32>
    %138 = vector.extract_strided_slice %125 {offsets = [0, 256], sizes = [8, 128], strides = [1, 1]} : vector<8x512xf32> to vector<8x128xf32>
    %139 = math.tanh %138 : vector<8x128xf32>
    %140 = vector.extract_strided_slice %125 {offsets = [0, 384], sizes = [8, 128], strides = [1, 1]} : vector<8x512xf32> to vector<8x128xf32>
    %141 = arith.negf %140 : vector<8x128xf32>
    %142 = math.exp %141 : vector<8x128xf32>
    %cst_90 = arith.constant 1.000000e+00 : f32
    %143 = vector.broadcast %cst_90 : f32 to vector<8x128xf32>
    %144 = arith.addf %143, %142 : vector<8x128xf32>
    %145 = arith.divf %143, %144 : vector<8x128xf32>
    %146 = arith.mulf %137, %116 : vector<8x128xf32>
    %147 = arith.mulf %131, %139 : vector<8x128xf32>
    %148 = arith.addf %146, %147 : vector<8x128xf32>
    %149 = math.tanh %148 : vector<8x128xf32>
    %150 = arith.mulf %145, %149 : vector<8x128xf32>
    %c0_91 = arith.constant 0 : index
    %c0_92 = arith.constant 0 : index
    %c0_93 = arith.constant 0 : index
    %151 = vector.load %arg14[%c0_91, %c0_92, %c0_93] : memref<2x8x128xf32, #tpu.memory_space<vmem>>, vector<1x8x128xf32>
    %152 = vector.shape_cast %151 : vector<1x8x128xf32> to vector<8x128xf32>
    %153 = vector.shape_cast %111 : vector<8x128xf32> to vector<1x8x128xf32>
    tpu.vector_store %arg14[%c0_91, %c0_92, %c0_93], %153 {strides = array<i32>} : memref<2x8x128xf32, #tpu.memory_space<vmem>>, vector<1x8x128xf32>,
    %c1_94 = arith.constant 1 : index
    %c0_95 = arith.constant 0 : index
    %c0_96 = arith.constant 0 : index
    %154 = vector.load %arg14[%c1_94, %c0_95, %c0_96] : memref<2x8x128xf32, #tpu.memory_space<vmem>>, vector<1x8x128xf32>
    %155 = vector.shape_cast %154 : vector<1x8x128xf32> to vector<8x128xf32>
    %156 = vector.shape_cast %150 : vector<8x128xf32> to vector<1x8x128xf32>
    tpu.vector_store %arg14[%c1_94, %c0_95, %c0_96], %156 {strides = array<i32>} : memref<2x8x128xf32, #tpu.memory_space<vmem>>, vector<1x8x128xf32>,
    %c0_97 = arith.constant 0 : index
    %c0_98 = arith.constant 0 : index
    %c0_99 = arith.constant 0 : index
    %157 = vector.load %arg15[%c0_97, %c0_98, %c0_99] : memref<2x8x128xf32, #tpu.memory_space<vmem>>, vector<1x8x128xf32>
    %158 = vector.shape_cast %157 : vector<1x8x128xf32> to vector<8x128xf32>
    %159 = vector.shape_cast %109 : vector<8x128xf32> to vector<1x8x128xf32>
    tpu.vector_store %arg15[%c0_97, %c0_98, %c0_99], %159 {strides = array<i32>} : memref<2x8x128xf32, #tpu.memory_space<vmem>>, vector<1x8x128xf32>,
    %c1_100 = arith.constant 1 : index
    %c0_101 = arith.constant 0 : index
    %c0_102 = arith.constant 0 : index
    %160 = vector.load %arg15[%c1_100, %c0_101, %c0_102] : memref<2x8x128xf32, #tpu.memory_space<vmem>>, vector<1x8x128xf32>
    %161 = vector.shape_cast %160 : vector<1x8x128xf32> to vector<8x128xf32>
    %162 = vector.shape_cast %148 : vector<8x128xf32> to vector<1x8x128xf32>
    tpu.vector_store %arg15[%c1_100, %c0_101, %c0_102], %162 {strides = array<i32>} : memref<2x8x128xf32, #tpu.memory_space<vmem>>, vector<1x8x128xf32>,
    %163 = arith.truncf %150 : vector<8x128xf32> to vector<8x128xbf16>
    %c0_103 = arith.constant 0 : index
    %c0_104 = arith.constant 0 : index
    %164 = vector.load %arg11[%c0_103, %c0_104] : memref<128x512xbf16, #tpu.memory_space<vmem>>, vector<128x512xbf16>
    %cst_105 = arith.constant dense<0.000000e+00> : vector<8x512xf32>
    %165 = tpu.matmul %163, %164, %cst_105 {dimension_numbers = #tpu.dot_dimension_numbers<[1], [0], [0], [1], [0, 0, 1, 1], [], []>} : vector<8x128xbf16>, vector<128x512xbf16>, vector<8x512xf32> -> vector<8x512xf32>
    %c0_106 = arith.constant 0 : index
    %c0_107 = arith.constant 0 : index
    %166 = vector.load %arg12[%c0_106, %c0_107] : memref<1x512xf32, #tpu.memory_space<vmem>>, vector<1x512xf32>
    %167 = vector.broadcast %166 : vector<1x512xf32> to vector<8x512xf32>
    %168 = arith.addf %165, %167 : vector<8x512xf32>
    %c0_108 = arith.constant 0 : index
    %c0_109 = arith.constant 0 : index
    %169 = vector.load %arg13[%c0_108, %c0_109] : memref<8x512xf32, #tpu.memory_space<vmem>>, vector<8x512xf32>
    tpu.vector_store %arg13[%c0_108, %c0_109], %168 {strides = array<i32>} : memref<8x512xf32, #tpu.memory_space<vmem>>, vector<8x512xf32>,
    return
  }
  func.func @transform_0(%arg0: i32) -> i32 {
    %c0_i32 = arith.constant 0 : i32
    %c0_i32_0 = arith.constant 0 : i32
    return %c0_i32 : i32
  }
  func.func @transform_2(%arg0: i32) -> (i32, i32, i32) {
    %c0_i32 = arith.constant 0 : i32
    %c0_i32_0 = arith.constant 0 : i32
    %c0_i32_1 = arith.constant 0 : i32
    %c0_i32_2 = arith.constant 0 : i32
    return %c0_i32, %c0_i32_0, %c0_i32_1 : i32, i32, i32
  }
  func.func @transform_3(%arg0: i32) -> (i32, i32, i32) {
    %c0_i32 = arith.constant 0 : i32
    %c0_i32_0 = arith.constant 0 : i32
    %c0_i32_1 = arith.constant 0 : i32
    %c0_i32_2 = arith.constant 0 : i32
    return %c0_i32, %c0_i32_0, %c0_i32_1 : i32, i32, i32
  }
  func.func @transform_4(%arg0: i32) -> (i32, i32) {
    %c0_i32 = arith.constant 0 : i32
    %c0_i32_0 = arith.constant 0 : i32
    %c0_i32_1 = arith.constant 0 : i32
    return %c0_i32, %c0_i32_0 : i32, i32
  }
  func.func @transform_5(%arg0: i32) -> (i32, i32) {
    %c0_i32 = arith.constant 0 : i32
    %c0_i32_0 = arith.constant 0 : i32
    %c0_i32_1 = arith.constant 0 : i32
    return %c0_i32, %c0_i32_0 : i32, i32
  }
  func.func @transform_6(%arg0: i32) -> (i32, i32) {
    %c0_i32 = arith.constant 0 : i32
    %c0_i32_0 = arith.constant 0 : i32
    %c0_i32_1 = arith.constant 0 : i32
    return %c0_i32, %c0_i32_0 : i32, i32
  }
  func.func @transform_7(%arg0: i32) -> (i32, i32) {
    %c0_i32 = arith.constant 0 : i32
    %c0_i32_0 = arith.constant 0 : i32
    %c0_i32_1 = arith.constant 0 : i32
    return %c0_i32, %c0_i32_0 : i32, i32
  }
  func.func @transform_8(%arg0: i32) -> (i32, i32) {
    %c0_i32 = arith.constant 0 : i32
    %c0_i32_0 = arith.constant 0 : i32
    %c0_i32_1 = arith.constant 0 : i32
    return %c0_i32, %c0_i32_0 : i32, i32
  }
  func.func @transform_9(%arg0: i32) -> (i32, i32) {
    %c0_i32 = arith.constant 0 : i32
    %c0_i32_0 = arith.constant 0 : i32
    %c0_i32_1 = arith.constant 0 : i32
    return %c0_i32, %c0_i32_0 : i32, i32
  }
  func.func @transform_10(%arg0: i32) -> (i32, i32) {
    %c0_i32 = arith.constant 0 : i32
    %c0_i32_0 = arith.constant 0 : i32
    %c0_i32_1 = arith.constant 0 : i32
    return %c0_i32, %c0_i32_0 : i32, i32
  }
  func.func @transform_11(%arg0: i32) -> (i32, i32) {
    %c0_i32 = arith.constant 0 : i32
    %c0_i32_0 = arith.constant 0 : i32
    %c0_i32_1 = arith.constant 0 : i32
    return %c0_i32, %c0_i32_0 : i32, i32
  }
  func.func @transform_12(%arg0: i32) -> (i32, i32) {
    %c0_i32 = arith.constant 0 : i32
    %c0_i32_0 = arith.constant 0 : i32
    %c0_i32_1 = arith.constant 0 : i32
    return %c0_i32, %c0_i32_0 : i32, i32
  }
  func.func @transform_13(%arg0: i32) -> (i32, i32, i32) {
    %c0_i32 = arith.constant 0 : i32
    %c0_i32_0 = arith.constant 0 : i32
    %c0_i32_1 = arith.constant 0 : i32
    %c0_i32_2 = arith.constant 0 : i32
    return %c0_i32, %c0_i32_0, %c0_i32_1 : i32, i32, i32
  }
  func.func @transform_14(%arg0: i32) -> (i32, i32, i32) {
    %c0_i32 = arith.constant 0 : i32
    %c0_i32_0 = arith.constant 0 : i32
    %c0_i32_1 = arith.constant 0 : i32
    %c0_i32_2 = arith.constant 0 : i32
    return %c0_i32, %c0_i32_0, %c0_i32_1 : i32, i32, i32
  }
}

</mosaic_0001>

<bundles_post_ra>
// kernel: decoder_lstm_forward.1
= control target key start
LH: loop header
LB: loop body
LE: loop exit
PB: predicated region body
PF: predicated region fallthrough
CT: control target
= control target key end

     0   :  { %20 = vsyncpa [#allocation7], 0  ;;  %s3291_s0 = inlined_call_operand.hbm [shape: s32[8], index: 0, kind: input, shape index: {}]   ;;  %s3292_s1 = inlined_call_operand.hbm [shape: f32[50,128], index: 1, kind: input, shape index: {}]   ;;  %s3293_s2 = inlined_call_operand.hbm [shape: f32[2,8,128], index: 2, kind: input, shape index: {}, may-alias: {2,13}]   ;;  %s3294_s3 = inlined_call_operand.hbm [shape: f32[2,8,128], index: 3, kind: input, shape index: {}, may-alias: {3,14}]   ;;  %s3295_s4 = inlined_call_operand.hbm [shape: bf16[128,512], index: 4, kind: input, shape index: {}]   ;;  %s3296_s5 = inlined_call_operand.hbm [shape: bf16[128,512], index: 5, kind: input, shape index: {}]   ;;  %s3297_s6 = inlined_call_operand.vmem [shape: f32[1,512], index: 6, kind: input, shape index: {}]   ;;  %s3298_s7 = inlined_call_operand.hbm [shape: bf16[128,512], index: 7, kind: input, shape index: {}]   ;;  %s3299_s8 = inlined_call_operand.hbm [shape: bf16[128,512], index: 8, kind: input, shape index: {}]   ;;  %s3300_s9 = inlined_call_operand.vmem [shape: f32[1,512], index: 9, kind: input, shape index: {}]   ;;  %s3301_s10 = inlined_call_operand.hbm [shape: bf16[128,512], index: 10, kind: input, shape index: {}]   ;;  %s3302_s11 = inlined_call_operand.vmem [shape: f32[1,512], index: 11, kind: input, shape index: {}]   ;;  %s3303_s12 = inlined_call_operand.vmem [shape: f32[8,512], index: 12, kind: output, shape index: {0}]   ;;  %s3304_s13 = inlined_call_operand.hbm [shape: f32[2,8,128], index: 13, kind: output, shape index: {1}, may-alias: {2,13}]   ;;  %s3305_s14 = inlined_call_operand.hbm [shape: f32[2,8,128], index: 14, kind: output, shape index: {2}, may-alias: {3,14}]  }
   0x1   :  { %21 = vsyncpa [#allocation5], 0 }
   0x2   :  { %22 = vsyncpa [#allocation10], 0 }
   0x3   :  { %23 = vsyncpa [#allocation13], 0 }
   0x4   :  { %24 = vsyncpa [#allocation16], 0 }
   0x5   :  { %25 = vsyncpa [#allocation6], 0 }
   0x6   :  { %26 = vsyncpa [#allocation20], 0  ;;  %s2834_s29 = smov [#allocation9]   ;;  %s2404_s17 = scalar_lea.hbm %s3294_s3, 256 }
   0x7   :  { %s52_s30 = sshll.u32 %s2834_s29, 4  ;;  %p2405_p0 = scmp.ne.s32.totalorder %s3294_s3, %s2404_s17  ;;  %s53_s30 = int_to_ptr.vmem [resolvable:$true] %s52_s30 }
   0x8   :  { %p2408_p1 = scmp.lt.u32.totalorder %s2404_s17, %s3294_s3 }
   0xa   :  { %p2410_p2 = pnand %p2408_p1, %p2405_p0 }
   0xc   :  { %2413 = shalt.err (!%p2410_p2)
}
   0xd   :  { %s2414_s22 = scalar_lea.vmem %s53_s30, 256  ;;  %p2419_p4 = scmp.lt.s32.totalorder %s53_s30, %s53_s30 }
   0xe   :  { %p2415_p3 = scmp.ne.s32.totalorder %s53_s30, %s2414_s22  ;;  %p2420_p5 = scmp.lt.s32.totalorder %s2414_s22, %s2414_s22 }
  0x10   :  { %p2421_p6 = por %p2420_p5, %p2419_p4 }
  0x12   :  { %p2422_p7 = pnand %p2421_p6, %p2415_p3 }
  0x14   :  { %2425 = shalt.err (!%p2422_p7)
}
  0x15   :  { %s2835_s23 = smov 128   ;;  %s2836_s24 = smov 8  }
  0x16   :  { %58 = dma.hbm_to_vmem [thread:$0]  %s3294_s3, 256, %s53_s30, [#allocation10], %s2835_s23, %s2835_s23, %s2836_s24  }
  0x17   :  { %s2837_s27 = smov [#allocation12]   ;;  %s2838_s29 = smov [#allocation15]  }
  0x18   :  { %s76_s28 = sshll.u32 %s2837_s27, 4  ;;  %s102_s15 = sshll.u32 %s2838_s29, 4  ;;  %s77_s28 = int_to_ptr.vmem [resolvable:$true] %s76_s28  ;;  %s103_s15 = int_to_ptr.vmem [resolvable:$true] %s102_s15 }
  0x19   :  { %s2426_s18 = scalar_lea.hbm %s3296_s5, 4096 }
  0x1a   :  { %p2427_p8 = scmp.ne.s32.totalorder %s3296_s5, %s2426_s18  ;;  %p2430_p9 = scmp.lt.u32.totalorder %s2426_s18, %s3296_s5 }
  0x1c   :  { %p2432_p10 = pnand %p2430_p9, %p2427_p8 }
  0x1e   :  { %2435 = shalt.err (!%p2432_p10)
}
  0x1f   :  { %s2436_s3 = scalar_lea.vmem %s77_s28, 4096  ;;  %p2441_p12 = scmp.lt.s32.totalorder %s77_s28, %s77_s28 }
  0x20   :  { %p2437_p11 = scmp.ne.s32.totalorder %s77_s28, %s2436_s3  ;;  %p2442_p13 = scmp.lt.s32.totalorder %s2436_s3, %s2436_s3 }
  0x22   :  { %p2443_p0 = por %p2442_p13, %p2441_p12 }
  0x24   :  { %p2444_p1 = pnand %p2443_p0, %p2437_p11 }
  0x26   :  { %2447 = shalt.err (!%p2444_p1)
}
  0x27   :  { %s2839_s30 = smov 256   ;;  %s2840_s25 = smov 16  }
  0x28   :  { %82 = dma.hbm_to_vmem [thread:$0]  %s3296_s5, 4096, %s77_s28, [#allocation13], %s2839_s30, %s2839_s30, %s2840_s25  }
  0x29   :  { %s2448_s17 = scalar_lea.hbm %s3299_s8, 4096 }
  0x2a   :  { %p2449_p2 = scmp.ne.s32.totalorder %s3299_s8, %s2448_s17  ;;  %p2452_p3 = scmp.lt.u32.totalorder %s2448_s17, %s3299_s8 }
  0x2c   :  { %p2454_p4 = pnand %p2452_p3, %p2449_p2 }
  0x2e   :  { %2457 = shalt.err (!%p2454_p4)
}
  0x2f   :  { %s2458_s22 = scalar_lea.vmem %s103_s15, 4096  ;;  %p2463_p6 = scmp.lt.s32.totalorder %s103_s15, %s103_s15 }
  0x30   :  { %p2459_p5 = scmp.ne.s32.totalorder %s103_s15, %s2458_s22  ;;  %p2464_p7 = scmp.lt.s32.totalorder %s2458_s22, %s2458_s22 }
  0x32   :  { %p2465_p8 = por %p2464_p7, %p2463_p6 }
  0x34   :  { %p2466_p9 = pnand %p2465_p8, %p2459_p5 }
  0x36   :  { %2469 = shalt.err (!%p2466_p9)
}
  0x37   :  { %108 = dma.hbm_to_vmem [thread:$0]  %s3299_s8, 4096, %s103_s15, [#allocation16], %s2839_s30, %s2839_s30, %s2840_s25  }
  0x38   :  { %s2470_s27 = scalar_lea.hbm %s3291_s0, 16 }
  0x39   :  { %p2471_p10 = scmp.ne.s32.totalorder %s3291_s0, %s2470_s27  ;;  %p2474_p11 = scmp.lt.u32.totalorder %s2470_s27, %s3291_s0 }
  0x3b   :  { %p2476_p12 = pnand %p2474_p11, %p2471_p10 }
  0x3d   :  { %2479 = shalt.err (!%p2476_p12)
}
  0x3e   :  { %s2841_s19 = smov [#allocation4]   ;;  %s2842_s8 = smov [#allocation8]  }
  0x3f   :  { %34 = dma.hbm_to_smem %s3291_s0, 16, %s2841_s19, [#allocation7]  }
  0x40   :  { %s40_s15 = sshll.u32 %s2842_s8, 4  ;;  %s2843_s22 = smov [#allocation11]   ;;  %s41_s15 = int_to_ptr.vmem [resolvable:$true] %s40_s15 }
  0x41   :  { %s64_s5 = sshll.u32 %s2843_s22, 4  ;;  %s2480_s26 = scalar_lea.hbm %s3293_s2, 256  ;;  %s2989_s5 = int_to_ptr.vmem [resolvable:$true] %s64_s5 }
  0x42   :  { %p2481_p13 = scmp.ne.s32.totalorder %s3293_s2, %s2480_s26  ;;  %p2484_p0 = scmp.lt.u32.totalorder %s2480_s26, %s3293_s2 }
  0x44   :  { %p2486_p1 = pnand %p2484_p0, %p2481_p13 }
  0x46   :  { %2489 = shalt.err (!%p2486_p1)
}
  0x47   :  { %s2490_s0 = scalar_lea.vmem %s41_s15, 256  ;;  %p2495_p3 = scmp.lt.s32.totalorder %s41_s15, %s41_s15 }
  0x48   :  { %p2491_p2 = scmp.ne.s32.totalorder %s41_s15, %s2490_s0  ;;  %p2496_p4 = scmp.lt.s32.totalorder %s2490_s0, %s2490_s0 }
  0x4a   :  { %p2497_p5 = por %p2496_p4, %p2495_p3 }
  0x4c   :  { %p2498_p6 = pnand %p2497_p5, %p2491_p2 }
  0x4e   :  { %2501 = shalt.err (!%p2498_p6)
}
  0x4f   :  { %46 = dma.hbm_to_vmem [thread:$0]  %s3293_s2, 256, %s41_s15, [#allocation5], %s2835_s23, %s2835_s23, %s2836_s24  }
  0x50   :  { %s2502_s8 = scalar_lea.hbm %s3295_s4, 4096 }
  0x51   :  { %p2503_p7 = scmp.ne.s32.totalorder %s3295_s4, %s2502_s8  ;;  %p2506_p8 = scmp.lt.u32.totalorder %s2502_s8, %s3295_s4 }
  0x53   :  { %p2508_p9 = pnand %p2506_p8, %p2503_p7 }
  0x55   :  { %2511 = shalt.err (!%p2508_p9)
}
  0x56   :  { %s2512_s29 = scalar_lea.vmem %s2989_s5, 4096  ;;  %p2517_p11 = scmp.lt.s32.totalorder %s2989_s5, %s2989_s5 }
  0x57   :  { %p2513_p10 = scmp.ne.s32.totalorder %s2989_s5, %s2512_s29  ;;  %p2518_p12 = scmp.lt.s32.totalorder %s2512_s29, %s2512_s29 }
  0x59   :  { %p2519_p13 = por %p2518_p12, %p2517_p11 }
  0x5b   :  { %p2520_p0 = pnand %p2519_p13, %p2513_p10 }
  0x5d   :  { %2523 = shalt.err (!%p2520_p0)
}
  0x5e   :  { %70 = dma.hbm_to_vmem [thread:$0]  %s3295_s4, 4096, %s2989_s5, [#allocation10], %s2839_s30, %s2839_s30, %s2840_s25  }
  0x5f   :  { %s2844_s27 = smov [#allocation14]   ;;  %s2845_s17 = smov [#allocation17]  }
  0x60   :  { %s90_s16 = sshll.u32 %s2844_s27, 4  ;;  %s116_s0 = sshll.u32 %s2845_s17, 4  ;;  %s91_s16 = int_to_ptr.vmem [resolvable:$true] %s90_s16  ;;  %s3026_s0 = int_to_ptr.vmem [resolvable:$true] %s116_s0 }
  0x61   :  { %s2524_s20 = scalar_lea.hbm %s3298_s7, 4096 }
  0x62   :  { %p2525_p1 = scmp.ne.s32.totalorder %s3298_s7, %s2524_s20  ;;  %p2528_p2 = scmp.lt.u32.totalorder %s2524_s20, %s3298_s7 }
  0x64   :  { %p2530_p3 = pnand %p2528_p2, %p2525_p1 }
  0x66   :  { %2533 = shalt.err (!%p2530_p3)
}
  0x67   :  { %s2534_s4 = scalar_lea.vmem %s91_s16, 4096  ;;  %p2539_p5 = scmp.lt.s32.totalorder %s91_s16, %s91_s16 }
  0x68   :  { %p2535_p4 = scmp.ne.s32.totalorder %s91_s16, %s2534_s4  ;;  %p2540_p6 = scmp.lt.s32.totalorder %s2534_s4, %s2534_s4 }
  0x6a   :  { %p2541_p7 = por %p2540_p6, %p2539_p5 }
  0x6c   :  { %p2542_p8 = pnand %p2541_p7, %p2535_p4 }
  0x6e   :  { %2545 = shalt.err (!%p2542_p8)
}
  0x6f   :  { %96 = dma.hbm_to_vmem [thread:$0]  %s3298_s7, 4096, %s91_s16, [#allocation13], %s2839_s30, %s2839_s30, %s2840_s25  }
  0x70   :  { %s2546_s2 = scalar_lea.hbm %s3301_s10, 4096 }
  0x71   :  { %p2547_p9 = scmp.ne.s32.totalorder %s3301_s10, %s2546_s2  ;;  %p2550_p10 = scmp.lt.u32.totalorder %s2546_s2, %s3301_s10 }
  0x73   :  { %p2552_p11 = pnand %p2550_p10, %p2547_p9 }
  0x75   :  { %2555 = shalt.err (!%p2552_p11)
}
  0x76   :  { %s2556_s19 = scalar_lea.vmem %s3026_s0, 4096  ;;  %p2561_p13 = scmp.lt.s32.totalorder %s3026_s0, %s3026_s0 }
  0x77   :  { %p2557_p12 = scmp.ne.s32.totalorder %s3026_s0, %s2556_s19  ;;  %p2562_p0 = scmp.lt.s32.totalorder %s2556_s19, %s2556_s19 }
  0x79   :  { %p2563_p1 = por %p2562_p0, %p2561_p13 }
  0x7b   :  { %p2564_p2 = pnand %p2563_p1, %p2557_p12 }
  0x7d   :  { %2567 = shalt.err (!%p2564_p2)
}
  0x7e   :  { %122 = dma.hbm_to_vmem [thread:$0]  %s3301_s10, 4096, %s3026_s0, [#allocation16], %s2839_s30, %s2839_s30, %s2840_s25  }
  0x7f   :  { %2804 = dma.done.wait [#allocation7], 16  }
  0x80   :  { %2805 = vsyncadd [#allocation7], 4294967280 }
  0x81   :  { %2806 = dma.done.wait [#allocation5], 256  }
  0x82   :  { %2807 = vsyncadd [#allocation5], 4294967040 }
  0x83   :  { %2808 = dma.done.wait [#allocation10], 4352  }
  0x84   :  { %2809 = vsyncadd [#allocation10], 4294962944 }
  0x85   :  { %2810 = dma.done.wait [#allocation13], 8192  }
  0x86   :  { %2811 = vsyncadd [#allocation13], 4294959104 }
  0x87   :  { %2812 = dma.done.wait [#allocation16], 8192  }
  0x88   :  { %2813 = vsyncadd [#allocation16], 4294959104 }
  0x89   :  { %149 = sfence }
  0x8a   :  { %s151_s20 = sld [smem:[#allocation4]]  ;;  %s2846_s21 = smov [#allocation2]  }
  0x8b   :  { %s168_s8 = sshll.u32 %s2846_s21, 4  ;;  %s3063_s22 = sld [smem:[#allocation4 + $0x1]]  ;;  %s3065_s8 = int_to_ptr.vmem [resolvable:$true] %s168_s8 }
  0x8c   :  { %s2847_s10 = smov [#allocation2 + $0x1]   ;;  %s3067_s25 = sld [smem:[#allocation4 + $0x2]] }
  0x8d   :  { %s183_s30 = sshll.u32 %s2847_s10, 4  ;;  %s2848_s0 = smov [#allocation2 + $0x2]   ;;  %s3069_s30 = int_to_ptr.vmem [resolvable:$true] %s183_s30 }
  0x8e   :  { %s198_s28 = sshll.u32 %s2848_s0, 4  ;;  %s3071_s4 = sld [smem:[#allocation4 + $0x3]]  ;;  %s3073_s28 = int_to_ptr.vmem [resolvable:$true] %s198_s28 }
  0x8f   :  { %s3082_s18 = scalar_lea.hbm %s3292_s1, 896 }
  0x90   :  { %s1927_s5 = sshll.u32 %s151_s20, 4 }
  0x91   :  { %s160_s29 = scalar_lea.hbm %s3292_s1, %s1927_s5  ;;  %s1928_s2 = sshll.u32 %s3063_s22, 4 }
  0x92   :  { %s2568_s15 = scalar_lea.hbm %s160_s29, 16  ;;  %p2571_p4 = scmp.lt.u32.totalorder %s160_s29, %s3292_s1 }
  0x93   :  { %p2569_p3 = scmp.ne.s32.totalorder %s160_s29, %s2568_s15  ;;  %p2572_p5 = scmp.lt.u32.totalorder %s3082_s18, %s2568_s15 }
  0x94   :  { %p2574_p7 = scmp.lt.u32.totalorder %s2568_s15, %s160_s29 }
  0x95   :  { %p2573_p6 = por %p2572_p5, %p2571_p4 }
  0x97   :  { %p2575_p8 = por %p2574_p7, %p2573_p6 }
  0x99   :  { %p2576_p9 = pnand %p2575_p8, %p2569_p3 }
  0x9b   :  { %2579 = shalt.err (!%p2576_p9)  }
  0x9c   :  { %s2580_s16 = scalar_lea.vmem %s3065_s8, 16  ;;  %s3091_s20 = scalar_lea.vmem %s3065_s8, 128 }
  0x9d   :  { %p2581_p10 = scmp.ne.s32.totalorder %s3065_s8, %s2580_s16  ;;  %p2585_p11 = scmp.lt.s32.totalorder %s3065_s8, %s3065_s8 }
  0x9e   :  { %p2586_p12 = scmp.lt.s32.totalorder %s3091_s20, %s2580_s16 }
  0xa0   :  { %p2587_p13 = por %p2586_p12, %p2585_p11 }
  0xa2   :  { %p2588_p0 = pnand %p2587_p13, %p2581_p10 }
  0xa4   :  { %2591 = shalt.err (!%p2588_p0)  }
  0xa5   :  { %171 = dma.hbm_to_vmem [thread:$0]  %s160_s29, 16, %s3065_s8, [#allocation3] }
  0xa6   :  { %s173_s10 = scalar_lea.hbm %s3292_s1, %s1928_s2  ;;  %s1929_s0 = sshll.u32 %s3067_s25, 4 }
  0xa7   :  { %s2592_s5 = scalar_lea.hbm %s173_s10, 16  ;;  %p2595_p2 = scmp.lt.u32.totalorder %s173_s10, %s3292_s1 }
  0xa8   :  { %p2593_p1 = scmp.ne.s32.totalorder %s173_s10, %s2592_s5  ;;  %p2596_p3 = scmp.lt.u32.totalorder %s3082_s18, %s2592_s5 }
  0xa9   :  { %p2598_p5 = scmp.lt.u32.totalorder %s2592_s5, %s173_s10 }
  0xaa   :  { %p2597_p4 = por %p2596_p3, %p2595_p2 }
  0xac   :  { %p2599_p6 = por %p2598_p5, %p2597_p4 }
  0xae   :  { %p2600_p7 = pnand %p2599_p6, %p2593_p1 }
  0xb0   :  { %2603 = shalt.err (!%p2600_p7)  }
  0xb1   :  { %s2604_s29 = scalar_lea.vmem %s3069_s30, 16  ;;  %p2609_p9 = scmp.lt.s32.totalorder %s3069_s30, %s3065_s8 }
  0xb2   :  { %p2605_p8 = scmp.ne.s32.totalorder %s3069_s30, %s2604_s29  ;;  %p2610_p10 = scmp.lt.s32.totalorder %s3091_s20, %s2604_s29 }
  0xb4   :  { %p2611_p11 = por %p2610_p10, %p2609_p9 }
  0xb6   :  { %p2612_p12 = pnand %p2611_p11, %p2605_p8 }
  0xb8   :  { %2615 = shalt.err (!%p2612_p12)  }
  0xb9   :  { %186 = dma.hbm_to_vmem [thread:$0]  %s173_s10, 16, %s3069_s30, [#allocation3 + $0x1] }
  0xba   :  { %s188_s15 = scalar_lea.hbm %s3292_s1, %s1929_s0  ;;  %s1930_s27 = sshll.u32 %s3071_s4, 4 }
  0xbb   :  { %s2616_s17 = scalar_lea.hbm %s188_s15, 16  ;;  %p2619_p0 = scmp.lt.u32.totalorder %s188_s15, %s3292_s1 }
  0xbc   :  { %p2617_p13 = scmp.ne.s32.totalorder %s188_s15, %s2616_s17  ;;  %p2620_p1 = scmp.lt.u32.totalorder %s3082_s18, %s2616_s17 }
  0xbd   :  { %p2622_p3 = scmp.lt.u32.totalorder %s2616_s17, %s188_s15 }
  0xbe   :  { %p2621_p2 = por %p2620_p1, %p2619_p0 }
  0xc0   :  { %p2623_p4 = por %p2622_p3, %p2621_p2 }
  0xc2   :  { %p2624_p5 = pnand %p2623_p4, %p2617_p13 }
  0xc4   :  { %2627 = shalt.err (!%p2624_p5)  }
  0xc5   :  { %s2628_s30 = scalar_lea.vmem %s3073_s28, 16  ;;  %p2633_p7 = scmp.lt.s32.totalorder %s3073_s28, %s3065_s8 }
  0xc6   :  { %p2629_p6 = scmp.ne.s32.totalorder %s3073_s28, %s2628_s30  ;;  %p2634_p8 = scmp.lt.s32.totalorder %s3091_s20, %s2628_s30 }
  0xc8   :  { %p2635_p9 = por %p2634_p8, %p2633_p7 }
  0xca   :  { %p2636_p10 = pnand %p2635_p9, %p2629_p6 }
  0xcc   :  { %2639 = shalt.err (!%p2636_p10)  }
  0xcd   :  { %201 = dma.hbm_to_vmem [thread:$0]  %s188_s15, 16, %s3073_s28, [#allocation3 + $0x2] }
  0xce   :  { %s203_s21 = scalar_lea.hbm %s3292_s1, %s1930_s27  ;;  %s2849_s22 = smov [#allocation2 + $0x3]  }
  0xcf   :  { %s213_s10 = sshll.u32 %s2849_s22, 4  ;;  %s3128_s0 = sld [smem:[#allocation4 + $0x4]]  ;;  %s214_s10 = int_to_ptr.vmem [resolvable:$true] %s213_s10 }
  0xd0   :  { %s2640_s5 = scalar_lea.hbm %s203_s21, 16  ;;  %p2643_p12 = scmp.lt.u32.totalorder %s203_s21, %s3292_s1 }
  0xd1   :  { %p2641_p11 = scmp.ne.s32.totalorder %s203_s21, %s2640_s5  ;;  %p2644_p13 = scmp.lt.u32.totalorder %s3082_s18, %s2640_s5 }
  0xd2   :  { %p2646_p1 = scmp.lt.u32.totalorder %s2640_s5, %s203_s21 }
  0xd3   :  { %p2645_p0 = por %p2644_p13, %p2643_p12 }
  0xd5   :  { %p2647_p2 = por %p2646_p1, %p2645_p0 }
  0xd7   :  { %p2648_p3 = pnand %p2647_p2, %p2641_p11 }
  0xd9   :  { %2651 = shalt.err (!%p2648_p3)  }
  0xda   :  { %s2652_s28 = scalar_lea.vmem %s214_s10, 16  ;;  %p2657_p5 = scmp.lt.s32.totalorder %s214_s10, %s3065_s8 }
  0xdb   :  { %p2653_p4 = scmp.ne.s32.totalorder %s214_s10, %s2652_s28  ;;  %p2658_p6 = scmp.lt.s32.totalorder %s3091_s20, %s2652_s28 }
  0xdd   :  { %p2659_p7 = por %p2658_p6, %p2657_p5 }
  0xdf   :  { %p2660_p8 = pnand %p2659_p7, %p2653_p4 }
  0xe1   :  { %2663 = shalt.err (!%p2660_p8)  }
  0xe2   :  { %216 = dma.hbm_to_vmem [thread:$0]  %s203_s21, 16, %s214_s10, [#allocation3 + $0x3] }
  0xe3   :  { %s2850_s29 = smov [#allocation2 + $0x4]   ;;  %s3136_s2 = sld [smem:[#allocation4 + $0x5]] }
  0xe4   :  { %s228_s25 = sshll.u32 %s2850_s29, 4  ;;  %s2851_s15 = smov [#allocation2 + $0x5]   ;;  %s229_s25 = int_to_ptr.vmem [resolvable:$true] %s228_s25 }
  0xe5   :  { %s243_s27 = sshll.u32 %s2851_s15, 4  ;;  %s3138_s17 = sld [smem:[#allocation4 + $0x6]]  ;;  %s3141_s27 = int_to_ptr.vmem [resolvable:$true] %s243_s27 }
  0xe6   :  { %s1931_s19 = sshll.u32 %s3128_s0, 4 }
  0xe7   :  { %s218_s4 = scalar_lea.hbm %s3292_s1, %s1931_s19 }
  0xe8   :  { %s2664_s16 = scalar_lea.hbm %s218_s4, 16  ;;  %p2667_p10 = scmp.lt.u32.totalorder %s218_s4, %s3292_s1 }
  0xe9   :  { %p2665_p9 = scmp.ne.s32.totalorder %s218_s4, %s2664_s16  ;;  %p2668_p11 = scmp.lt.u32.totalorder %s3082_s18, %s2664_s16 }
  0xea   :  { %p2670_p13 = scmp.lt.u32.totalorder %s2664_s16, %s218_s4 }
  0xeb   :  { %p2669_p12 = por %p2668_p11, %p2667_p10 }
  0xed   :  { %p2671_p0 = por %p2670_p13, %p2669_p12 }
  0xef   :  { %p2672_p1 = pnand %p2671_p0, %p2665_p9 }
  0xf1   :  { %2675 = shalt.err (!%p2672_p1)  }
  0xf2   :  { %s2676_s10 = scalar_lea.vmem %s229_s25, 16  ;;  %p2681_p3 = scmp.lt.s32.totalorder %s229_s25, %s3065_s8 }
  0xf3   :  { %p2677_p2 = scmp.ne.s32.totalorder %s229_s25, %s2676_s10  ;;  %p2682_p4 = scmp.lt.s32.totalorder %s3091_s20, %s2676_s10 }
  0xf5   :  { %p2683_p5 = por %p2682_p4, %p2681_p3 }
  0xf7   :  { %p2684_p6 = pnand %p2683_p5, %p2677_p2 }
  0xf9   :  { %2687 = shalt.err (!%p2684_p6)  }
  0xfa   :  { %231 = dma.hbm_to_vmem [thread:$0]  %s218_s4, 16, %s229_s25, [#allocation3 + $0x4] }
  0xfb   :  { %s1932_s0 = sshll.u32 %s3136_s2, 4  ;;  %s2852_s5 = smov [#allocation2 + $0x6]  }
  0xfc   :  { %s258_s3 = sshll.u32 %s2852_s5, 4  ;;  %s233_s29 = scalar_lea.hbm %s3292_s1, %s1932_s0  ;;  %s3156_s3 = int_to_ptr.vmem [resolvable:$true] %s258_s3 }
  0xfd   :  { %s2688_s15 = scalar_lea.hbm %s233_s29, 16  ;;  %p2691_p8 = scmp.lt.u32.totalorder %s233_s29, %s3292_s1 }
  0xfe   :  { %p2689_p7 = scmp.ne.s32.totalorder %s233_s29, %s2688_s15  ;;  %p2692_p9 = scmp.lt.u32.totalorder %s3082_s18, %s2688_s15 }
  0xff   :  { %p2694_p11 = scmp.lt.u32.totalorder %s2688_s15, %s233_s29 }
 0x100   :  { %p2693_p10 = por %p2692_p9, %p2691_p8 }
 0x102   :  { %p2695_p12 = por %p2694_p11, %p2693_p10 }
 0x104   :  { %p2696_p13 = pnand %p2695_p12, %p2689_p7 }
 0x106   :  { %2699 = shalt.err (!%p2696_p13)  }
 0x107   :  { %s2700_s25 = scalar_lea.vmem %s3141_s27, 16  ;;  %p2705_p1 = scmp.lt.s32.totalorder %s3141_s27, %s3065_s8 }
 0x108   :  { %p2701_p0 = scmp.ne.s32.totalorder %s3141_s27, %s2700_s25  ;;  %p2706_p2 = scmp.lt.s32.totalorder %s3091_s20, %s2700_s25 }
 0x10a   :  { %p2707_p3 = por %p2706_p2, %p2705_p1 }
 0x10c   :  { %p2708_p4 = pnand %p2707_p3, %p2701_p0 }
 0x10e   :  { %2711 = shalt.err (!%p2708_p4)  }
 0x10f   :  { %246 = dma.hbm_to_vmem [thread:$0]  %s233_s29, 16, %s3141_s27, [#allocation3 + $0x5] }
 0x110   :  { %s1933_s2 = sshll.u32 %s3138_s17, 4  ;;  %s1926_s30 = sld [smem:[#allocation4 + $0x7]] }
 0x111   :  { %s248_s21 = scalar_lea.hbm %s3292_s1, %s1933_s2 }
 0x112   :  { %s2712_s22 = scalar_lea.hbm %s248_s21, 16  ;;  %p2715_p6 = scmp.lt.u32.totalorder %s248_s21, %s3292_s1 }
 0x113   :  { %p2713_p5 = scmp.ne.s32.totalorder %s248_s21, %s2712_s22  ;;  %p2716_p7 = scmp.lt.u32.totalorder %s3082_s18, %s2712_s22 }
 0x114   :  { %p2718_p9 = scmp.lt.u32.totalorder %s2712_s22, %s248_s21 }
 0x115   :  { %p2717_p8 = por %p2716_p7, %p2715_p6 }
 0x117   :  { %p2719_p10 = por %p2718_p9, %p2717_p8 }
 0x119   :  { %p2720_p11 = pnand %p2719_p10, %p2713_p5 }
 0x11b   :  { %2723 = shalt.err (!%p2720_p11)  }
 0x11c   :  { %s2724_s27 = scalar_lea.vmem %s3156_s3, 16  ;;  %p2729_p13 = scmp.lt.s32.totalorder %s3156_s3, %s3065_s8 }
 0x11d   :  { %p2725_p12 = scmp.ne.s32.totalorder %s3156_s3, %s2724_s27  ;;  %p2730_p0 = scmp.lt.s32.totalorder %s3091_s20, %s2724_s27 }
 0x11f   :  { %p2731_p1 = por %p2730_p0, %p2729_p13 }
 0x121   :  { %p2732_p2 = pnand %p2731_p1, %p2725_p12 }
 0x123   :  { %2735 = shalt.err (!%p2732_p2)  }
 0x124   :  { %261 = dma.hbm_to_vmem [thread:$0]  %s248_s21, 16, %s3156_s3, [#allocation3 + $0x6] }
 0x125   :  { %s2853_s17 = smov [#allocation2 + $0x7]   ;;  %s1934_s26 = sshll.u32 %s1926_s30, 4 }
 0x126   :  { %s273_s5 = sshll.u32 %s2853_s17, 4  ;;  %s263_s15 = scalar_lea.hbm %s3292_s1, %s1934_s26  ;;  %s274_s5 = int_to_ptr.vmem [resolvable:$true] %s273_s5 }
 0x127   :  { %s2736_s19 = scalar_lea.hbm %s263_s15, 16  ;;  %p2739_p4 = scmp.lt.u32.totalorder %s263_s15, %s3292_s1 }
 0x128   :  { %p2737_p3 = scmp.ne.s32.totalorder %s263_s15, %s2736_s19  ;;  %p2740_p5 = scmp.lt.u32.totalorder %s3082_s18, %s2736_s19 }
 0x129   :  { %p2742_p7 = scmp.lt.u32.totalorder %s2736_s19, %s263_s15 }
 0x12a   :  { %p2741_p6 = por %p2740_p5, %p2739_p4 }
 0x12c   :  { %p2743_p8 = por %p2742_p7, %p2741_p6 }
 0x12e   :  { %p2744_p9 = pnand %p2743_p8, %p2737_p3 }
 0x130   :  { %2747 = shalt.err (!%p2744_p9)  }
 0x131   :  { %s2748_s3 = scalar_lea.vmem %s274_s5, 16  ;;  %p2753_p11 = scmp.lt.s32.totalorder %s274_s5, %s3065_s8 }
 0x132   :  { %p2749_p10 = scmp.ne.s32.totalorder %s274_s5, %s2748_s3  ;;  %p2754_p12 = scmp.lt.s32.totalorder %s3091_s20, %s2748_s3 }
 0x134   :  { %p2755_p13 = por %p2754_p12, %p2753_p11 }
 0x136   :  { %p2756_p0 = pnand %p2755_p13, %p2749_p10 }
 0x138   :  { %2759 = shalt.err (!%p2756_p0)  }
 0x139   :  { %276 = dma.hbm_to_vmem [thread:$0]  %s263_s15, 16, %s274_s5, [#allocation3 + $0x7] }
 0x13a   :  { %2814 = dma.done.wait [#allocation3], 16 }
 0x13b   :  { %2815 = vsyncadd [#allocation3], 4294967280 }
 0x13c   :  { %2816 = dma.done.wait [#allocation3 + $0x1], 16 }
 0x13d   :  { %2817 = vsyncadd [#allocation3 + $0x1], 4294967280 }
 0x13e   :  { %2818 = dma.done.wait [#allocation3 + $0x2], 16 }
 0x13f   :  { %2819 = vsyncadd [#allocation3 + $0x2], 4294967280 }
 0x140   :  { %2820 = dma.done.wait [#allocation3 + $0x3], 16 }
 0x141   :  { %2821 = vsyncadd [#allocation3 + $0x3], 4294967280 }
 0x142   :  { %2822 = dma.done.wait [#allocation3 + $0x4], 16 }
 0x143   :  { %2823 = vsyncadd [#allocation3 + $0x4], 4294967280 }
 0x144   :  { %2824 = dma.done.wait [#allocation3 + $0x5], 16 }
 0x145   :  { %2825 = vsyncadd [#allocation3 + $0x5], 4294967280 }
 0x146   :  { %2826 = dma.done.wait [#allocation3 + $0x6], 16 }
 0x147   :  { %2827 = vsyncadd [#allocation3 + $0x6], 4294967280 }
 0x148   :  { %2828 = dma.done.wait [#allocation3 + $0x7], 16 }
 0x149   :  { %2829 = vsyncadd [#allocation3 + $0x7], 4294967280  ;;  %v2854_v0 = vmov 0   ;;  %v2132_v1 = vld [vmem:[#allocation12 + $0x4] ss:$16 sps:$4 sm:$0xff]   ;;  %s2856_s2 = smov [#allocation19]  }
 0x14a   :  { %555 = vmatprep.mubr.bf16.mxu0 %v2854_v0  ;;  %596 = vmatprep.mubr.bf16.mxu1 %v2854_v0  ;;  %v2134_v2 = vld [vmem:[#allocation12 + $0xc] ss:$16 sps:$4 sm:$0xff]   ;;  %v2136_v3 = vld [vmem:[#allocation12] ss:$16 sps:$4 sm:$0xff]   ;;  %v2137_v4 = vld [vmem:[#allocation12 + $0x8] ss:$16 sps:$4 sm:$0xff]  }
 0x14b   :  { %523 = vmatprep.subr.bf16.mxu0 %v2132_v1  ;;  %564 = vmatprep.subr.bf16.mxu1 %v2134_v2  ;;  %v2138_v5 = vld [vmem:[#allocation12 + $0x24] ss:$16 sps:$4 sm:$0xff]   ;;  %v2140_v6 = vld [vmem:[#allocation12 + $0x2c] ss:$16 sps:$4 sm:$0xff]   ;;  %v2142_v7 = vld [vmem:[#allocation12 + $0x20] ss:$16 sps:$4 sm:$0xff]  }
 0x14c   :  { %524 = vmatpush1.bf16.msra.mxu0 %v2136_v3  ;;  %565 = vmatpush1.bf16.msra.mxu1 %v2137_v4  ;;  %v2143_v8 = vld [vmem:[#allocation12 + $0x28] ss:$16 sps:$4 sm:$0xff]   ;;  %v2144_v9 = vld [vmem:[#allocation12 + $0x44] ss:$16 sps:$4 sm:$0xff]   ;;  %v2146_v10 = vld [vmem:[#allocation12 + $0x4c] ss:$16 sps:$4 sm:$0xff]  }
 0x14d   :  { %525 = vmatprep.subr.bf16.mxu0 %v2138_v5  ;;  %566 = vmatprep.subr.bf16.mxu1 %v2140_v6  ;;  %v2148_v11 = vld [vmem:[#allocation12 + $0x40] ss:$16 sps:$4 sm:$0xff]   ;;  %v2149_v12 = vld [vmem:[#allocation12 + $0x48] ss:$16 sps:$4 sm:$0xff]   ;;  %v2150_v13 = vld [vmem:[#allocation12 + $0x64] ss:$16 sps:$4 sm:$0xff]  }
 0x14e   :  { %v2152_v14 = vld [vmem:[#allocation12 + $0x6c] ss:$16 sps:$4 sm:$0xff]   ;;  %v2154_v15 = vld [vmem:[#allocation12 + $0x60] ss:$16 sps:$4 sm:$0xff]   ;;  %v2155_v16 = vld [vmem:[#allocation12 + $0x68] ss:$16 sps:$4 sm:$0xff]  }
 0x14f   :  { %v2156_v17 = vld [vmem:[#allocation12 + $0x84] ss:$16 sps:$4 sm:$0xff]   ;;  %v2158_v18 = vld [vmem:[#allocation12 + $0x8c] ss:$16 sps:$4 sm:$0xff]   ;;  %v2160_v19 = vld [vmem:[#allocation12 + $0x80] ss:$16 sps:$4 sm:$0xff]  }
 0x150   :  { %526 = vmatpush1.bf16.msra.mxu0 %v2142_v7  ;;  %567 = vmatpush1.bf16.msra.mxu1 %v2143_v8  ;;  %v2161_v20 = vld [vmem:[#allocation12 + $0x88] ss:$16 sps:$4 sm:$0xff]   ;;  %v2162_v21 = vld [vmem:[#allocation12 + $0xa4] ss:$16 sps:$4 sm:$0xff]   ;;  %v2164_v22 = vld [vmem:[#allocation12 + $0xac] ss:$16 sps:$4 sm:$0xff]  }
 0x151   :  { %527 = vmatprep.subr.bf16.mxu0 %v2144_v9  ;;  %568 = vmatprep.subr.bf16.mxu1 %v2146_v10  ;;  %v2166_v23 = vld [vmem:[#allocation12 + $0xa0] ss:$16 sps:$4 sm:$0xff]   ;;  %v2167_v24 = vld [vmem:[#allocation12 + $0xa8] ss:$16 sps:$4 sm:$0xff]   ;;  %v2168_v25 = vld [vmem:[#allocation12 + $0xc4] ss:$16 sps:$4 sm:$0xff]  }
 0x152   :  { %v2170_v26 = vld [vmem:[#allocation12 + $0xcc] ss:$16 sps:$4 sm:$0xff]   ;;  %v2172_v27 = vld [vmem:[#allocation12 + $0xc0] ss:$16 sps:$4 sm:$0xff]   ;;  %v2173_v28 = vld [vmem:[#allocation12 + $0xc8] ss:$16 sps:$4 sm:$0xff]  }
 0x153   :  { %v2174_v29 = vld [vmem:[#allocation12 + $0xe4] ss:$16 sps:$4 sm:$0xff]   ;;  %v2176_v30 = vld [vmem:[#allocation12 + $0xec] ss:$16 sps:$4 sm:$0xff]   ;;  %v2178_v31 = vld [vmem:[#allocation12 + $0xe0] ss:$16 sps:$4 sm:$0xff]  }
 0x154   :  { %528 = vmatpush1.bf16.msra.mxu0 %v2148_v11  ;;  %569 = vmatpush1.bf16.msra.mxu1 %v2149_v12  ;;  %v2179_v32 = vld [vmem:[#allocation12 + $0xe8] ss:$16 sps:$4 sm:$0xff]   ;;  %v296_v33 = vld [vmem:[#allocation8] sm:$0xff]  ;;  %v2185_v35 = vld [vmem:[#allocation11 + $0xc] ss:$16 sps:$4 sm:$0xff]   ;;  %s1827_s30 = sshll.u32 %s2856_s2, 4  ;;  %s3235_s30 = int_to_ptr.vmem [resolvable:$true] %s1827_s30 }
 0x155   :  { %529 = vmatprep.subr.bf16.mxu0 %v2150_v13  ;;  %570 = vmatprep.subr.bf16.mxu1 %v2152_v14  ;;  %v2182_v34 = vld [vmem:[#allocation11 + $0x4] ss:$16 sps:$4 sm:$0xff]   ;;  %v330_v36 = vpack.c.bf16 %v296_v33, %v296_v33  ;;  %v2180_v37 = vld [vmem:[#allocation11] ss:$16 sps:$4 sm:$0xff]   ;;  %v2183_v38 = vld [vmem:[#allocation11 + $0x8] ss:$16 sps:$4 sm:$0xff]  }
 0x156   :  { %v2188_v39 = vld [vmem:[#allocation11 + $0x24] ss:$16 sps:$4 sm:$0xff]   ;;  %v2191_v40 = vld [vmem:[#allocation11 + $0x2c] ss:$16 sps:$4 sm:$0xff]   ;;  %v2186_v41 = vld [vmem:[#allocation11 + $0x20] ss:$16 sps:$4 sm:$0xff]  }
 0x157   :  { %v2189_v42 = vld [vmem:[#allocation11 + $0x28] ss:$16 sps:$4 sm:$0xff]   ;;  %v2194_v43 = vld [vmem:[#allocation11 + $0x44] ss:$16 sps:$4 sm:$0xff]   ;;  %v2197_v44 = vld [vmem:[#allocation11 + $0x4c] ss:$16 sps:$4 sm:$0xff]  }
 0x158   :  { %530 = vmatpush1.bf16.msra.mxu0 %v2154_v15  ;;  %571 = vmatpush1.bf16.msra.mxu1 %v2155_v16  ;;  %v2192_v45 = vld [vmem:[#allocation11 + $0x40] ss:$16 sps:$4 sm:$0xff]   ;;  %v2195_v46 = vld [vmem:[#allocation11 + $0x48] ss:$16 sps:$4 sm:$0xff]   ;;  %v2200_v47 = vld [vmem:[#allocation11 + $0x64] ss:$16 sps:$4 sm:$0xff]  }
 0x159   :  { %531 = vmatprep.subr.bf16.mxu0 %v2156_v17  ;;  %572 = vmatprep.subr.bf16.mxu1 %v2158_v18  ;;  %v2203_v48 = vld [vmem:[#allocation11 + $0x6c] ss:$16 sps:$4 sm:$0xff]   ;;  %v2198_v49 = vld [vmem:[#allocation11 + $0x60] ss:$16 sps:$4 sm:$0xff]   ;;  %v2201_v50 = vld [vmem:[#allocation11 + $0x68] ss:$16 sps:$4 sm:$0xff]  }
 0x15a   :  { %v2206_v51 = vld [vmem:[#allocation11 + $0x84] ss:$16 sps:$4 sm:$0xff]   ;;  %v2209_v52 = vld [vmem:[#allocation11 + $0x8c] ss:$16 sps:$4 sm:$0xff]   ;;  %v2204_v53 = vld [vmem:[#allocation11 + $0x80] ss:$16 sps:$4 sm:$0xff]  }
 0x15b   :  { %v2207_v54 = vld [vmem:[#allocation11 + $0x88] ss:$16 sps:$4 sm:$0xff]   ;;  %v2212_v55 = vld [vmem:[#allocation11 + $0xa4] ss:$16 sps:$4 sm:$0xff]   ;;  %v2215_v56 = vld [vmem:[#allocation11 + $0xac] ss:$16 sps:$4 sm:$0xff]  }
 0x15c   :  { %532 = vmatpush1.bf16.msra.mxu0 %v2160_v19  ;;  %573 = vmatpush1.bf16.msra.mxu1 %v2161_v20  ;;  %v2210_v57 = vld [vmem:[#allocation11 + $0xa0] ss:$16 sps:$4 sm:$0xff]   ;;  %v2213_v58 = vld [vmem:[#allocation11 + $0xa8] ss:$16 sps:$4 sm:$0xff]   ;;  %v2218_v59 = vld [vmem:[#allocation11 + $0xc4] ss:$16 sps:$4 sm:$0xff]  }
 0x15d   :  { %533 = vmatprep.subr.bf16.mxu0 %v2162_v21  ;;  %574 = vmatprep.subr.bf16.mxu1 %v2164_v22  ;;  %v2221_v60 = vld [vmem:[#allocation11 + $0xcc] ss:$16 sps:$4 sm:$0xff]   ;;  %v2216_v61 = vld [vmem:[#allocation11 + $0xc0] ss:$16 sps:$4 sm:$0xff]   ;;  %v2219_v62 = vld [vmem:[#allocation11 + $0xc8] ss:$16 sps:$4 sm:$0xff]  }
 0x15e   :  { %v2224_v63 = vld [vmem:[#allocation11 + $0xe4] ss:$16 sps:$4 sm:$0xff]   ;;  %v2227_v1 = vld [vmem:[#allocation11 + $0xec] ss:$16 sps:$4 sm:$0xff]   ;;  %v2222_v2 = vld [vmem:[#allocation11 + $0xe0] ss:$16 sps:$4 sm:$0xff]  }
 0x15f   :  { %v2225_v3 = vld [vmem:[#allocation11 + $0xe8] ss:$16 sps:$4 sm:$0xff]   ;;  %v2228_v6 = vld [vmem:[#allocation15] ss:$16 sps:$4 sm:$0xff]   ;;  %v2230_v7 = vld [vmem:[#allocation15 + $0x4] ss:$16 sps:$4 sm:$0xff]  }
 0x160   :  { %534 = vmatpush1.bf16.msra.mxu0 %v2166_v23  ;;  %575 = vmatpush1.bf16.msra.mxu1 %v2167_v24  ;;  %v294_v4 = vld [vmem:[#allocation2] sm:$0xff]  ;;  %v2236_v10 = vld [vmem:[#allocation15 + $0x24] ss:$16 sps:$4 sm:$0xff]   ;;  %v2234_v12 = vld [vmem:[#allocation15 + $0x20] ss:$16 sps:$4 sm:$0xff]  }
 0x161   :  { %535 = vmatprep.subr.bf16.mxu0 %v2168_v25  ;;  %576 = vmatprep.subr.bf16.mxu1 %v2170_v26  ;;  %v295_v5 = vpack.c.bf16 %v294_v4, %v294_v4  ;;  %v2231_v8 = vld [vmem:[#allocation15 + $0x8] ss:$16 sps:$4 sm:$0xff]   ;;  %v2233_v9 = vld [vmem:[#allocation15 + $0xc] ss:$16 sps:$4 sm:$0xff]   ;;  %v2242_v14 = vld [vmem:[#allocation15 + $0x44] ss:$16 sps:$4 sm:$0xff]  }
 0x162   :  { %v2239_v11 = vld [vmem:[#allocation15 + $0x2c] ss:$16 sps:$4 sm:$0xff]   ;;  %v2237_v13 = vld [vmem:[#allocation15 + $0x28] ss:$16 sps:$4 sm:$0xff]   ;;  %v2240_v16 = vld [vmem:[#allocation15 + $0x40] ss:$16 sps:$4 sm:$0xff]  }
 0x163   :  { %v2245_v15 = vld [vmem:[#allocation15 + $0x4c] ss:$16 sps:$4 sm:$0xff]   ;;  %v2243_v17 = vld [vmem:[#allocation15 + $0x48] ss:$16 sps:$4 sm:$0xff]   ;;  %v2248_v18 = vld [vmem:[#allocation15 + $0x64] ss:$16 sps:$4 sm:$0xff]  }
 0x164   :  { %536 = vmatpush1.bf16.msra.mxu0 %v2172_v27  ;;  %577 = vmatpush1.bf16.msra.mxu1 %v2173_v28  ;;  %v2251_v19 = vld [vmem:[#allocation15 + $0x6c] ss:$16 sps:$4 sm:$0xff]   ;;  %v2246_v20 = vld [vmem:[#allocation15 + $0x60] ss:$16 sps:$4 sm:$0xff]   ;;  %v2249_v21 = vld [vmem:[#allocation15 + $0x68] ss:$16 sps:$4 sm:$0xff]  }
 0x165   :  { %537 = vmatprep.subr.bf16.mxu0 %v2174_v29  ;;  %578 = vmatprep.subr.bf16.mxu1 %v2176_v30  ;;  %v2254_v22 = vld [vmem:[#allocation15 + $0x84] ss:$16 sps:$4 sm:$0xff]   ;;  %v2252_v23 = vld [vmem:[#allocation15 + $0x80] ss:$16 sps:$4 sm:$0xff]   ;;  %v2257_v24 = vld [vmem:[#allocation15 + $0x8c] ss:$16 sps:$4 sm:$0xff]  }
 0x166   :  { %v2255_v25 = vld [vmem:[#allocation15 + $0x88] ss:$16 sps:$4 sm:$0xff]   ;;  %v2260_v26 = vld [vmem:[#allocation15 + $0xa4] ss:$16 sps:$4 sm:$0xff]   ;;  %v2258_v27 = vld [vmem:[#allocation15 + $0xa0] ss:$16 sps:$4 sm:$0xff]  }
 0x167   :  { %v2263_v28 = vld [vmem:[#allocation15 + $0xac] ss:$16 sps:$4 sm:$0xff]   ;;  %v2261_v29 = vld [vmem:[#allocation15 + $0xa8] ss:$16 sps:$4 sm:$0xff]   ;;  %v2266_v30 = vld [vmem:[#allocation15 + $0xc4] ss:$16 sps:$4 sm:$0xff]  }
 0x168   :  { %538 = vmatpush1.bf16.msra.mxu0 %v2178_v31  ;;  %579 = vmatpush1.bf16.msra.mxu1 %v2179_v32  ;;  %v2264_v31 = vld [vmem:[#allocation15 + $0xc0] ss:$16 sps:$4 sm:$0xff]   ;;  %v2269_v32 = vld [vmem:[#allocation15 + $0xcc] ss:$16 sps:$4 sm:$0xff]   ;;  %v2267_v33 = vld [vmem:[#allocation15 + $0xc8] ss:$16 sps:$4 sm:$0xff]  }
 0x169   :  { %765 = vmatprep.subr.bf16.mxu0 %v2182_v34  ;;  %806 = vmatprep.subr.bf16.mxu1 %v2185_v35  ;;  %v2272_v34 = vld [vmem:[#allocation15 + $0xe4] ss:$16 sps:$4 sm:$0xff]   ;;  %v2270_v35 = vld [vmem:[#allocation15 + $0xe0] ss:$16 sps:$4 sm:$0xff]   ;;  %v2315_v4 = vld [vmem:[#allocation14 + $0xc8] ss:$16 sps:$4 sm:$0xff]  }
 0x16b   :  { %556 = vmatmul.mubr.bf16.vlgmr.msra.gmra.mrb[0].mxu0 %v330_v36  ;;  %597 = vmatmul.mubr.bf16.vlgmr.msra.gmra.mrb[0].mxu1 %v330_v36  ;;  %v2275_v36 = vld [vmem:[#allocation15 + $0xec] ss:$16 sps:$4 sm:$0xff]  }
 0x16c   :  { %766 = vmatpush1.bf16.msra.mxu0 %v2180_v37  ;;  %807 = vmatpush1.bf16.msra.mxu1 %v2183_v38  ;;  %v2273_v37 = vld [vmem:[#allocation15 + $0xe8] ss:$16 sps:$4 sm:$0xff]  }
 0x16d   :  { %767 = vmatprep.subr.bf16.mxu0 %v2188_v39  ;;  %808 = vmatprep.subr.bf16.mxu1 %v2191_v40  ;;  %v899_v38 = vld [vmem:[#allocation8 + $0x8] sm:$0xff]  ;;  %v2278_v40 = vld [vmem:[#allocation14 + $0x4] ss:$16 sps:$4 sm:$0xff]  }
 0x16e   :  { %797 = vmatprep.mubr.bf16.mxu0 %v2854_v0  ;;  %838 = vmatprep.mubr.bf16.mxu1 %v2854_v0  ;;  %v934_v39 = vpack.c.bf16 %v899_v38, %v899_v38 }
 0x170   :  { %768 = vmatpush1.bf16.msra.mxu0 %v2186_v41  ;;  %809 = vmatpush1.bf16.msra.mxu1 %v2189_v42  ;;  %v2281_v41 = vld [vmem:[#allocation14 + $0xc] ss:$16 sps:$4 sm:$0xff]   ;;  %v2276_v42 = vld [vmem:[#allocation14] ss:$16 sps:$4 sm:$0xff]  }
 0x171   :  { %769 = vmatprep.subr.bf16.mxu0 %v2194_v43  ;;  %810 = vmatprep.subr.bf16.mxu1 %v2197_v44  ;;  %v2279_v43 = vld [vmem:[#allocation14 + $0x8] ss:$16 sps:$4 sm:$0xff]   ;;  %v2284_v44 = vld [vmem:[#allocation14 + $0x24] ss:$16 sps:$4 sm:$0xff]  }
 0x174   :  { %770 = vmatpush1.bf16.msra.mxu0 %v2192_v45  ;;  %811 = vmatpush1.bf16.msra.mxu1 %v2195_v46  ;;  %v2287_v45 = vld [vmem:[#allocation14 + $0x2c] ss:$16 sps:$4 sm:$0xff]   ;;  %v2282_v46 = vld [vmem:[#allocation14 + $0x20] ss:$16 sps:$4 sm:$0xff]  }
 0x175   :  { %771 = vmatprep.subr.bf16.mxu0 %v2200_v47  ;;  %812 = vmatprep.subr.bf16.mxu1 %v2203_v48  ;;  %v2285_v47 = vld [vmem:[#allocation14 + $0x28] ss:$16 sps:$4 sm:$0xff]   ;;  %v2290_v48 = vld [vmem:[#allocation14 + $0x44] ss:$16 sps:$4 sm:$0xff]  }
 0x178   :  { %772 = vmatpush1.bf16.msra.mxu0 %v2198_v49  ;;  %813 = vmatpush1.bf16.msra.mxu1 %v2201_v50  ;;  %v2293_v49 = vld [vmem:[#allocation14 + $0x4c] ss:$16 sps:$4 sm:$0xff]   ;;  %v2288_v50 = vld [vmem:[#allocation14 + $0x40] ss:$16 sps:$4 sm:$0xff]  }
 0x179   :  { %773 = vmatprep.subr.bf16.mxu0 %v2206_v51  ;;  %814 = vmatprep.subr.bf16.mxu1 %v2209_v52  ;;  %v2291_v51 = vld [vmem:[#allocation14 + $0x48] ss:$16 sps:$4 sm:$0xff]   ;;  %v2296_v52 = vld [vmem:[#allocation14 + $0x64] ss:$16 sps:$4 sm:$0xff]  }
 0x17c   :  { %774 = vmatpush1.bf16.msra.mxu0 %v2204_v53  ;;  %815 = vmatpush1.bf16.msra.mxu1 %v2207_v54  ;;  %v2299_v53 = vld [vmem:[#allocation14 + $0x6c] ss:$16 sps:$4 sm:$0xff]   ;;  %v2294_v54 = vld [vmem:[#allocation14 + $0x60] ss:$16 sps:$4 sm:$0xff]  }
 0x17d   :  { %775 = vmatprep.subr.bf16.mxu0 %v2212_v55  ;;  %816 = vmatprep.subr.bf16.mxu1 %v2215_v56  ;;  %v2297_v55 = vld [vmem:[#allocation14 + $0x68] ss:$16 sps:$4 sm:$0xff]   ;;  %v2302_v56 = vld [vmem:[#allocation14 + $0x84] ss:$16 sps:$4 sm:$0xff]  }
 0x180   :  { %776 = vmatpush1.bf16.msra.mxu0 %v2210_v57  ;;  %817 = vmatpush1.bf16.msra.mxu1 %v2213_v58  ;;  %v2305_v57 = vld [vmem:[#allocation14 + $0x8c] ss:$16 sps:$4 sm:$0xff]   ;;  %v2300_v58 = vld [vmem:[#allocation14 + $0x80] ss:$16 sps:$4 sm:$0xff]  }
 0x181   :  { %777 = vmatprep.subr.bf16.mxu0 %v2218_v59  ;;  %818 = vmatprep.subr.bf16.mxu1 %v2221_v60  ;;  %v2303_v59 = vld [vmem:[#allocation14 + $0x88] ss:$16 sps:$4 sm:$0xff]   ;;  %v2308_v60 = vld [vmem:[#allocation14 + $0xa4] ss:$16 sps:$4 sm:$0xff]  }
 0x184   :  { %778 = vmatpush1.bf16.msra.mxu0 %v2216_v61  ;;  %819 = vmatpush1.bf16.msra.mxu1 %v2219_v62  ;;  %v2306_v61 = vld [vmem:[#allocation14 + $0xa0] ss:$16 sps:$4 sm:$0xff]   ;;  %v2311_v62 = vld [vmem:[#allocation14 + $0xac] ss:$16 sps:$4 sm:$0xff]  }
 0x185   :  { %779 = vmatprep.subr.bf16.mxu0 %v2224_v63  ;;  %820 = vmatprep.subr.bf16.mxu1 %v2227_v1  ;;  %v2309_v63 = vld [vmem:[#allocation14 + $0xa8] ss:$16 sps:$4 sm:$0xff]   ;;  %v2314_v1 = vld [vmem:[#allocation14 + $0xc4] ss:$16 sps:$4 sm:$0xff]  }
 0x188   :  { %780 = vmatpush1.bf16.msra.mxu0 %v2222_v2  ;;  %821 = vmatpush1.bf16.msra.mxu1 %v2225_v3  ;;  %v2317_v2 = vld [vmem:[#allocation14 + $0xcc] ss:$16 sps:$4 sm:$0xff]   ;;  %v2312_v3 = vld [vmem:[#allocation14 + $0xc0] ss:$16 sps:$4 sm:$0xff]  }
 0x189   :  { %1127 = vmatprep.subr.bf16.mxu0 %v2230_v7  ;;  %1168 = vmatprep.subr.bf16.mxu1 %v2233_v9  ;;  %v2318_v7 = vld [vmem:[#allocation14 + $0xe0] ss:$16 sps:$4 sm:$0xff]  }
 0x18b   :  { %798 = vmatmul.mubr.bf16.vlgmr.msra.gmra.mrb[4].mxu0 %v295_v5  ;;  %839 = vmatmul.mubr.bf16.vlgmr.msra.gmra.mrb[4].mxu1 %v295_v5  ;;  %v2320_v5 = vld [vmem:[#allocation14 + $0xe4] ss:$16 sps:$4 sm:$0xff]  }
 0x18c   :  { %1159 = vmatprep.mubr.bf16.mxu0 %v2854_v0  ;;  %1200 = vmatprep.mubr.bf16.mxu1 %v2854_v0 }
 0x18d   :  { %1128 = vmatpush1.bf16.msra.mxu0 %v2228_v6  ;;  %1169 = vmatpush1.bf16.msra.mxu1 %v2231_v8  ;;  %v2323_v6 = vld [vmem:[#allocation14 + $0xec] ss:$16 sps:$4 sm:$0xff]   ;;  %v2321_v8 = vld [vmem:[#allocation14 + $0xe8] ss:$16 sps:$4 sm:$0xff]  }
 0x18e   :  { %1129 = vmatprep.subr.bf16.mxu0 %v2236_v10  ;;  %1170 = vmatprep.subr.bf16.mxu1 %v2239_v11 }
 0x191   :  { %1130 = vmatpush1.bf16.msra.mxu0 %v2234_v12  ;;  %1171 = vmatpush1.bf16.msra.mxu1 %v2237_v13 }
 0x192   :  { %1131 = vmatprep.subr.bf16.mxu0 %v2242_v14  ;;  %1172 = vmatprep.subr.bf16.mxu1 %v2245_v15 }
 0x195   :  { %1132 = vmatpush1.bf16.msra.mxu0 %v2240_v16  ;;  %1173 = vmatpush1.bf16.msra.mxu1 %v2243_v17  ;;  %v849_v17 = vlaneseq }
 0x196   :  { %1133 = vmatprep.subr.bf16.mxu0 %v2248_v18  ;;  %1174 = vmatprep.subr.bf16.mxu1 %v2251_v19 }
 0x197   :  { %v850_v18 = vshrl.u32 %v849_v17, 7  ;;  %v2341_v17 = vld [vmem:[#allocation17 + $0x4c] ss:$16 sps:$4 sm:$0xff]  }
 0x199   :  { %1134 = vmatpush1.bf16.msra.mxu0 %v2246_v20  ;;  %1175 = vmatpush1.bf16.msra.mxu1 %v2249_v21  ;;  %v3199_v19 = vsub.s32 0, %v850_v18  ;;  %v847_v20 = vld [vmem:[%s3297_s6] sm:$0xf]  ;;  %v3204_v21 = vsub.s32 1, %v850_v18 }
 0x19a   :  { %1135 = vmatprep.subr.bf16.mxu0 %v2254_v22  ;;  %1176 = vmatprep.subr.bf16.mxu1 %v2257_v24 }
 0x19b   :  { %v852_v22 = vrot.slane %v847_v20, %v3199_v19 }
 0x19d   :  { %1136 = vmatpush1.bf16.msra.mxu0 %v2252_v23  ;;  %1177 = vmatpush1.bf16.msra.mxu1 %v2255_v25  ;;  %v856_v25 = vrot.slane %v847_v20, %v3204_v21 }
 0x19e   :  { %1137 = vmatprep.subr.bf16.mxu0 %v2260_v26  ;;  %1178 = vmatprep.subr.bf16.mxu1 %v2263_v28 }
 0x1a1   :  { %1138 = vmatpush1.bf16.msra.mxu0 %v2258_v27  ;;  %1179 = vmatpush1.bf16.msra.mxu1 %v2261_v29 }
 0x1a2   :  { %1139 = vmatprep.subr.bf16.mxu0 %v2266_v30  ;;  %1180 = vmatprep.subr.bf16.mxu1 %v2269_v32  ;;  %v3208_v32 = vsub.s32 3, %v850_v18 }
 0x1a5   :  { %1140 = vmatpush1.bf16.msra.mxu0 %v2264_v31  ;;  %1181 = vmatpush1.bf16.msra.mxu1 %v2267_v33 }
 0x1a6   :  { %1141 = vmatprep.subr.bf16.mxu0 %v2272_v34  ;;  %1182 = vmatprep.subr.bf16.mxu1 %v2275_v36 }
 0x1a9   :  { %1142 = vmatpush1.bf16.msra.mxu0 %v2270_v35  ;;  %1183 = vmatpush1.bf16.msra.mxu1 %v2273_v37 }
 0x1aa   :  { %1369 = vmatprep.subr.bf16.mxu0 %v2278_v40  ;;  %1410 = vmatprep.subr.bf16.mxu1 %v2281_v41  ;;  %v864_v41 = vrot.slane %v847_v20, %v3208_v32 }
 0x1ac   :  { %1160 = vmatmul.mubr.bf16.vlgmr.msra.gmra.mrb[8].mxu0 %v934_v39  ;;  %1201 = vmatmul.mubr.bf16.vlgmr.msra.gmra.mrb[8].mxu1 %v934_v39 }
 0x1ad   :  { %1401 = vmatprep.mubr.bf16.mxu0 %v2854_v0  ;;  %1370 = vmatpush1.bf16.msra.mxu0 %v2276_v42  ;;  %v3211_v42 = vsub.s32 2, %v850_v18  ;;  %v2336_v18 = vld [vmem:[#allocation17 + $0x40] ss:$16 sps:$4 sm:$0xff]  }
 0x1ae   :  { %1411 = vmatpush1.bf16.msra.mxu1 %v2279_v43  ;;  %1442 = vmatprep.mubr.bf16.mxu1 %v2854_v0 }
 0x1af   :  { %1371 = vmatprep.subr.bf16.mxu0 %v2284_v44  ;;  %1412 = vmatprep.subr.bf16.mxu1 %v2287_v45  ;;  %v860_v44 = vrot.slane %v847_v20, %v3211_v42  ;;  %v2339_v20 = vld [vmem:[#allocation17 + $0x48] ss:$16 sps:$4 sm:$0xff]  }
 0x1b1   :  { %1372 = vmatpush1.bf16.msra.mxu0 %v2282_v46 }
 0x1b2   :  { %1413 = vmatpush1.bf16.msra.mxu1 %v2285_v47  ;;  %1373 = vmatprep.subr.bf16.mxu0 %v2290_v48 }
 0x1b3   :  { %1414 = vmatprep.subr.bf16.mxu1 %v2293_v49 }
 0x1b5   :  { %1374 = vmatpush1.bf16.msra.mxu0 %v2288_v50 }
 0x1b6   :  { %1415 = vmatpush1.bf16.msra.mxu1 %v2291_v51  ;;  %1375 = vmatprep.subr.bf16.mxu0 %v2296_v52 }
 0x1b7   :  { %1416 = vmatprep.subr.bf16.mxu1 %v2299_v53  ;;  %v297_v53 = vld [vmem:[#allocation9] sm:$0xff] }
 0x1b9   :  { %1376 = vmatpush1.bf16.msra.mxu0 %v2294_v54 }
 0x1ba   :  { %1417 = vmatpush1.bf16.msra.mxu1 %v2297_v55  ;;  %1377 = vmatprep.subr.bf16.mxu0 %v2302_v56 }
 0x1bb   :  { %1418 = vmatprep.subr.bf16.mxu1 %v2305_v57 }
 0x1bd   :  { %1378 = vmatpush1.bf16.msra.mxu0 %v2300_v58 }
 0x1be   :  { %1419 = vmatpush1.bf16.msra.mxu1 %v2303_v59  ;;  %1379 = vmatprep.subr.bf16.mxu0 %v2308_v60 }
 0x1bf   :  { %1420 = vmatprep.subr.bf16.mxu1 %v2311_v62 }
 0x1c1   :  { %1380 = vmatpush1.bf16.msra.mxu0 %v2306_v61 }
 0x1c2   :  { %1421 = vmatpush1.bf16.msra.mxu1 %v2309_v63  ;;  %1381 = vmatprep.subr.bf16.mxu0 %v2314_v1 }
 0x1c3   :  { %1422 = vmatprep.subr.bf16.mxu1 %v2317_v2 }
 0x1c5   :  { %1382 = vmatpush1.bf16.msra.mxu0 %v2312_v3 }
 0x1c6   :  { %1423 = vmatpush1.bf16.msra.mxu1 %v2315_v4  ;;  %1383 = vmatprep.subr.bf16.mxu0 %v2320_v5 }
 0x1c7   :  { %1424 = vmatprep.subr.bf16.mxu1 %v2323_v6 }
 0x1c9   :  { %1384 = vmatpush1.bf16.msra.mxu0 %v2318_v7 }
 0x1ca   :  { %1425 = vmatpush1.bf16.msra.mxu1 %v2321_v8 }
 0x23e   :  { %v557_v9 = vpop.f32.mrb[0].mxu0  ;;  %v598_v10 = vpop.f32.mrb[0].mxu1 }
 0x23f   :  { %v559_v11 = vpop.f32.mrb[1].mxu0  ;;  %v600_v12 = vpop.f32.mrb[1].mxu1 }
 0x240   :  { %v561_v13 = vpop.f32.mrb[2].mxu0  ;;  %v602_v14 = vpop.f32.mrb[2].mxu1 }
 0x241   :  { %v562_v15 = vpop.f32.mrb[3].mxu0  ;;  %v603_v16 = vpop.f32.mrb[3].mxu1  ;;  %v2335_v13 = vld [vmem:[#allocation17 + $0x2c] ss:$16 sps:$4 sm:$0xff]   ;;  %v2330_v14 = vld [vmem:[#allocation17 + $0x20] ss:$16 sps:$4 sm:$0xff]  }
 0x242   :  { %v2333_v15 = vld [vmem:[#allocation17 + $0x28] ss:$16 sps:$4 sm:$0xff]   ;;  %v2338_v16 = vld [vmem:[#allocation17 + $0x44] ss:$16 sps:$4 sm:$0xff]  }
 0x25e   :  { %v799_v23 = vpop.f32.mrb[4].mxu0  ;;  %v840_v24 = vpop.f32.mrb[4].mxu1 }
 0x25f   :  { %v800_v26 = vadd.f32 %v799_v23, %v557_v9  ;;  %v841_v27 = vadd.f32 %v840_v24, %v598_v10  ;;  %v801_v28 = vpop.f32.mrb[5].mxu0  ;;  %v842_v29 = vpop.f32.mrb[5].mxu1  ;;  %v2326_v9 = vld [vmem:[#allocation17 + $0x4] ss:$16 sps:$4 sm:$0xff]   ;;  %v2329_v10 = vld [vmem:[#allocation17 + $0xc] ss:$16 sps:$4 sm:$0xff]  }
 0x260   :  { %v802_v30 = vadd.f32 %v801_v28, %v559_v11  ;;  %v843_v31 = vadd.f32 %v842_v29, %v600_v12  ;;  %v803_v33 = vpop.f32.mrb[6].mxu0  ;;  %v844_v34 = vpop.f32.mrb[6].mxu1  ;;  %v2324_v11 = vld [vmem:[#allocation17] ss:$16 sps:$4 sm:$0xff]   ;;  %v2327_v12 = vld [vmem:[#allocation17 + $0x8] ss:$16 sps:$4 sm:$0xff]   ;;  %1722 = vmatprep.subr.bf16.mxu0 %v2326_v9  ;;  %1763 = vmatprep.subr.bf16.mxu1 %v2329_v10 }
 0x261   :  { %v869_v35 = vadd.f32 %v852_v22, %v800_v26  ;;  %v804_v36 = vpop.f32.mrb[7].mxu0  ;;  %v845_v37 = vpop.f32.mrb[7].mxu1  ;;  %v871_v46 = vadd.f32 %v860_v44, %v841_v27  ;;  %v2344_v22 = vld [vmem:[#allocation17 + $0x64] ss:$16 sps:$4 sm:$0xff]   ;;  %v2347_v23 = vld [vmem:[#allocation17 + $0x6c] ss:$16 sps:$4 sm:$0xff]  }
 0x262   :  { %v870_v38 = vadd.f32 %v856_v25, %v802_v30  ;;  %v872_v43 = vadd.f32 %v864_v41, %v843_v31  ;;  %v2342_v24 = vld [vmem:[#allocation17 + $0x60] ss:$16 sps:$4 sm:$0xff]   ;;  %v2345_v25 = vld [vmem:[#allocation17 + $0x68] ss:$16 sps:$4 sm:$0xff]   ;;  %v2350_v26 = vld [vmem:[#allocation17 + $0x84] ss:$16 sps:$4 sm:$0xff]  }
 0x263   :  { %v1999_v39 = vmul.f32 -1.442695, %v869_v35  ;;  %v2353_v27 = vld [vmem:[#allocation17 + $0x8c] ss:$16 sps:$4 sm:$0xff]   ;;  %v2348_v28 = vld [vmem:[#allocation17 + $0x80] ss:$16 sps:$4 sm:$0xff]  }
 0x264   :  { %v2000_v40 = vmul.f32 -1.442695, %v870_v38  ;;  %v2001_v45 = vmul.f32 -1.442695, %v872_v43  ;;  %v2351_v29 = vld [vmem:[#allocation17 + $0x88] ss:$16 sps:$4 sm:$0xff]  }
 0x265   :  { %2372 = vpow2.f32 %v1999_v39  ;;  %v2356_v30 = vld [vmem:[#allocation17 + $0xa4] ss:$16 sps:$4 sm:$0xff]   ;;  %v2354_v31 = vld [vmem:[#allocation17 + $0xa0] ss:$16 sps:$4 sm:$0xff]   ;;  %v2357_v33 = vld [vmem:[#allocation17 + $0xa8] ss:$16 sps:$4 sm:$0xff]  }
 0x266   :  { %2374 = vpow2.f32 %v2000_v40  ;;  %v2359_v34 = vld [vmem:[#allocation17 + $0xac] ss:$16 sps:$4 sm:$0xff]   ;;  %v2362_v35 = vld [vmem:[#allocation17 + $0xc4] ss:$16 sps:$4 sm:$0xff]   ;;  %v2360_v37 = vld [vmem:[#allocation17 + $0xc0] ss:$16 sps:$4 sm:$0xff]  }
 0x267   :  { %2376 = vpow2.f32 %v2001_v45  ;;  %v2365_v36 = vld [vmem:[#allocation17 + $0xcc] ss:$16 sps:$4 sm:$0xff]   ;;  %v2363_v38 = vld [vmem:[#allocation17 + $0xc8] ss:$16 sps:$4 sm:$0xff]   ;;  %v2368_v39 = vld [vmem:[#allocation17 + $0xe4] ss:$16 sps:$4 sm:$0xff]  }
 0x268   :  { %2378 = vtanh.f32 %v871_v46  ;;  %v2371_v40 = vld [vmem:[#allocation17 + $0xec] ss:$16 sps:$4 sm:$0xff]   ;;  %v2366_v41 = vld [vmem:[#allocation17 + $0xe0] ss:$16 sps:$4 sm:$0xff]   ;;  %v2369_v43 = vld [vmem:[#allocation17 + $0xe8] ss:$16 sps:$4 sm:$0xff]  }
 0x269   :  { %v1451_v44 = vld [vmem:[%s3300_s9] sm:$0xf]  ;;  %s2855_s9 = smov [#allocation18]  }
 0x26a   :  { %v1456_v45 = vrot.slane %v1451_v44, %v3199_v19  ;;  %s1815_s20 = sshll.u32 %s2855_s9, 4  ;;  %s1816_s20 = int_to_ptr.vmem [resolvable:$true] %s1815_s20 }
 0x26b   :  { %s2760_s4 = scalar_lea.vmem %s1816_s20, 256  ;;  %p2765_p2 = scmp.lt.s32.totalorder %s1816_s20, %s1816_s20 }
 0x26c   :  { %p2761_p1 = scmp.ne.s32.totalorder %s1816_s20, %s2760_s4  ;;  %p2766_p3 = scmp.lt.s32.totalorder %s2760_s4, %s2760_s4 }
 0x26e   :  { %p2767_p4 = por %p2766_p3, %p2765_p2 }
 0x26f   :  { %v2373_v47 = vpop.eup %2372 }
 0x270   :  { %v2375_v48 = vpop.eup %2374  ;;  %v876_v49 = vadd.f32 1.0, %v2373_v47  ;;  %p2768_p5 = pnand %p2767_p4, %p2761_p1 }
 0x271   :  { %v882_v50 = vadd.f32 1.0, %v2375_v48  ;;  %v2377_v51 = vpop.eup %2376  ;;  %v1460_v48 = vrot.slane %v1451_v44, %v3204_v21 }
 0x272   :  { %2380 = vrcp.f32 %v876_v49  ;;  %v2379_v52 = vpop.eup %2378  ;;  %v889_v57 = vadd.f32 1.0, %v2377_v51 }
 0x273   :  { %2382 = vrcp.f32 %v882_v50 }
 0x274   :  { %2384 = vrcp.f32 %v889_v57 }
 0x27c   :  { %v2381_v54 = vpop.eup %2380 }
 0x27d   :  { %v2383_v55 = vpop.eup %2382  ;;  %v893_v56 = vmul.f32 %v2381_v54, %v2379_v52 }
 0x27e   :  { %v892_v58 = vmul.f32 %v2383_v55, %v297_v53  ;;  %v2385_v60 = vpop.eup %2384 }
 0x27f   :  { %v3216_v1 = vpop.f32.mrb[8].mxu0  ;;  %v3220_v5 = vpop.f32.mrb[8].mxu1 }
 0x280   :  { %v894_v59 = vadd.f32 %v893_v56, %v892_v58  ;;  %v3218_v2 = vpop.f32.mrb[9].mxu0  ;;  %v3222_v6 = vpop.f32.mrb[9].mxu1 }
 0x281   :  { %v1165_v3 = vpop.f32.mrb[10].mxu0  ;;  %v1206_v7 = vpop.f32.mrb[10].mxu1 }
 0x282   :  { %1504 = vst [vmem:[#allocation19] sm:$0xff] %v894_v59  ;;  %2386 = vtanh.f32 %v894_v59  ;;  %v1166_v4 = vpop.f32.mrb[11].mxu0  ;;  %v1207_v8 = vpop.f32.mrb[11].mxu1  ;;  %v1464_v3 = vrot.slane %v1451_v44, %v3211_v42 }
 0x28c   :  { %v2387_v61 = vpop.eup %2386 }
 0x28d   :  { %v896_v62 = vmul.f32 %v2387_v61, %v2385_v60 }
 0x28f   :  { %v897_v63 = vpack.c.bf16 %v896_v62, %v896_v62  ;;  %1501 = vst [vmem:[#allocation18] sm:$0xff] %v896_v62 }
 0x291   :  { %1402 = vmatmul.mubr.bf16.vlgmr.msra.gmra.mrb[12].mxu0 %v897_v63  ;;  %1443 = vmatmul.mubr.bf16.vlgmr.msra.gmra.mrb[12].mxu1 %v897_v63  ;;  %v1468_v63 = vrot.slane %v1451_v44, %v3208_v32 }
 0x292   :  { %1754 = vmatprep.mubr.bf16.mxu0 %v2854_v0  ;;  %1795 = vmatprep.mubr.bf16.mxu1 %v2854_v0  ;;  %v2332_v0 = vld [vmem:[#allocation17 + $0x24] ss:$16 sps:$4 sm:$0xff]  }
 0x293   :  { %1723 = vmatpush1.bf16.msra.mxu0 %v2324_v11  ;;  %1764 = vmatpush1.bf16.msra.mxu1 %v2327_v12  ;;  %v901_v11 = vld [vmem:[#allocation9 + $0x8] sm:$0xff] }
 0x294   :  { %1724 = vmatprep.subr.bf16.mxu0 %v2332_v0  ;;  %1765 = vmatprep.subr.bf16.mxu1 %v2335_v13 }
 0x297   :  { %1725 = vmatpush1.bf16.msra.mxu0 %v2330_v14  ;;  %1766 = vmatpush1.bf16.msra.mxu1 %v2333_v15 }
 0x298   :  { %1726 = vmatprep.subr.bf16.mxu0 %v2338_v16  ;;  %1767 = vmatprep.subr.bf16.mxu1 %v2341_v17 }
 0x29b   :  { %1727 = vmatpush1.bf16.msra.mxu0 %v2336_v18  ;;  %1768 = vmatpush1.bf16.msra.mxu1 %v2339_v20 }
 0x29c   :  { %1728 = vmatprep.subr.bf16.mxu0 %v2344_v22  ;;  %1769 = vmatprep.subr.bf16.mxu1 %v2347_v23 }
 0x29f   :  { %1729 = vmatpush1.bf16.msra.mxu0 %v2342_v24  ;;  %1770 = vmatpush1.bf16.msra.mxu1 %v2345_v25 }
 0x2a0   :  { %1730 = vmatprep.subr.bf16.mxu0 %v2350_v26  ;;  %1771 = vmatprep.subr.bf16.mxu1 %v2353_v27 }
 0x2a3   :  { %1731 = vmatpush1.bf16.msra.mxu0 %v2348_v28  ;;  %1772 = vmatpush1.bf16.msra.mxu1 %v2351_v29 }
 0x2a4   :  { %1732 = vmatprep.subr.bf16.mxu0 %v2356_v30  ;;  %1773 = vmatprep.subr.bf16.mxu1 %v2359_v34 }
 0x2a7   :  { %1733 = vmatpush1.bf16.msra.mxu0 %v2354_v31  ;;  %1774 = vmatpush1.bf16.msra.mxu1 %v2357_v33 }
 0x2a8   :  { %1734 = vmatprep.subr.bf16.mxu0 %v2362_v35  ;;  %1775 = vmatprep.subr.bf16.mxu1 %v2365_v36 }
 0x2ab   :  { %1735 = vmatpush1.bf16.msra.mxu0 %v2360_v37  ;;  %1776 = vmatpush1.bf16.msra.mxu1 %v2363_v38 }
 0x2ac   :  { %1736 = vmatprep.subr.bf16.mxu0 %v2368_v39  ;;  %1777 = vmatprep.subr.bf16.mxu1 %v2371_v40 }
 0x2af   :  { %1737 = vmatpush1.bf16.msra.mxu0 %v2366_v41  ;;  %1778 = vmatpush1.bf16.msra.mxu1 %v2369_v43 }
 0x364   :  { %v1403_v46 = vpop.f32.mrb[12].mxu0  ;;  %v1444_v47 = vpop.f32.mrb[12].mxu1 }
 0x365   :  { %v1404_v49 = vadd.f32 %v1403_v46, %v3216_v1  ;;  %v1445_v50 = vadd.f32 %v1444_v47, %v3220_v5  ;;  %v1405_v51 = vpop.f32.mrb[13].mxu0  ;;  %v1446_v52 = vpop.f32.mrb[13].mxu1 }
 0x366   :  { %v1406_v53 = vadd.f32 %v1405_v51, %v3218_v2  ;;  %v1447_v54 = vadd.f32 %v1446_v52, %v3222_v6  ;;  %v1407_v55 = vpop.f32.mrb[14].mxu0  ;;  %v1448_v56 = vpop.f32.mrb[14].mxu1 }
 0x367   :  { %v1473_v57 = vadd.f32 %v1456_v45, %v1404_v49  ;;  %v1408_v58 = vpop.f32.mrb[15].mxu0  ;;  %v1449_v59 = vpop.f32.mrb[15].mxu1  ;;  %v1475_v5 = vadd.f32 %v1464_v3, %v1445_v50 }
 0x368   :  { %v1474_v60 = vadd.f32 %v1460_v48, %v1406_v53  ;;  %v1476_v1 = vadd.f32 %v1468_v63, %v1447_v54 }
 0x369   :  { %v2066_v61 = vmul.f32 -1.442695, %v1473_v57 }
 0x36a   :  { %v2067_v62 = vmul.f32 -1.442695, %v1474_v60  ;;  %v2068_v4 = vmul.f32 -1.442695, %v1476_v1 }
 0x36b   :  { %2388 = vpow2.f32 %v2066_v61 }
 0x36c   :  { %2390 = vpow2.f32 %v2067_v62 }
 0x36d   :  { %2392 = vpow2.f32 %v2068_v4 }
 0x36e   :  { %2394 = vtanh.f32 %v1475_v5 }
 0x375   :  { %v2389_v2 = vpop.eup %2388 }
 0x376   :  { %v2391_v7 = vpop.eup %2390  ;;  %v1480_v6 = vadd.f32 1.0, %v2389_v2 }
 0x377   :  { %v1486_v8 = vadd.f32 1.0, %v2391_v7  ;;  %v2393_v9 = vpop.eup %2392 }
 0x378   :  { %2396 = vrcp.f32 %v1480_v6  ;;  %v2395_v10 = vpop.eup %2394  ;;  %v1493_v14 = vadd.f32 1.0, %v2393_v9 }
 0x379   :  { %2398 = vrcp.f32 %v1486_v8 }
 0x37a   :  { %2400 = vrcp.f32 %v1493_v14 }
 0x382   :  { %v2397_v12 = vpop.eup %2396 }
 0x383   :  { %v2399_v0 = vpop.eup %2398  ;;  %v1497_v13 = vmul.f32 %v2397_v12, %v2395_v10 }
 0x384   :  { %v1496_v15 = vmul.f32 %v2399_v0, %v901_v11  ;;  %v2401_v17 = vpop.eup %2400 }
 0x386   :  { %v1498_v16 = vadd.f32 %v1497_v13, %v1496_v15 }
 0x388   :  { %1506 = vst [vmem:[#allocation19 + $0x8] sm:$0xff] %v1498_v16  ;;  %2402 = vtanh.f32 %v1498_v16 }
 0x392   :  { %v2403_v18 = vpop.eup %2402 }
 0x393   :  { %v1500_v20 = vmul.f32 %v2403_v18, %v2401_v17 }
 0x395   :  { %v1507_v22 = vpack.c.bf16 %v1500_v20, %v1500_v20  ;;  %1503 = vst [vmem:[#allocation18 + $0x8] sm:$0xff] %v1500_v20 }
 0x397   :  { %1755 = vmatmul.mubr.bf16.vlgmr.msra.gmra.mrb[16].mxu0 %v1507_v22  ;;  %1796 = vmatmul.mubr.bf16.vlgmr.msra.gmra.mrb[16].mxu1 %v1507_v22 }
 0x398   :  { %2771 = shalt.err (!%p2768_p5)
}
 0x399   :  { %s2772_s22 = scalar_lea.hbm %s3304_s13, 256 }
 0x39a   :  { %p2773_p6 = scmp.ne.s32.totalorder %s3304_s13, %s2772_s22  ;;  %p2776_p7 = scmp.lt.u32.totalorder %s2772_s22, %s3304_s13 }
 0x39c   :  { %p2778_p8 = pnand %p2776_p7, %p2773_p6 }
 0x39e   :  { %2781 = shalt.err (!%p2778_p8)
}
 0x39f   :  { %1821 = dma.vmem_to_hbm [thread:$0]  %s1816_s20, 256, %s3304_s13, [#allocation6], %s2835_s23, %s2835_s23, %s2836_s24  }
 0x3a0   :  { %s2782_s28 = scalar_lea.vmem %s3235_s30, 256  ;;  %p2787_p10 = scmp.lt.s32.totalorder %s3235_s30, %s3235_s30 }
 0x3a1   :  { %p2783_p9 = scmp.ne.s32.totalorder %s3235_s30, %s2782_s28  ;;  %p2788_p11 = scmp.lt.s32.totalorder %s2782_s28, %s2782_s28 }
 0x3a3   :  { %p2789_p12 = por %p2788_p11, %p2787_p10 }
 0x3a5   :  { %p2790_p13 = pnand %p2789_p12, %p2783_p9 }
 0x3a7   :  { %2793 = shalt.err (!%p2790_p13)
}
 0x3a8   :  { %s2794_s19 = scalar_lea.hbm %s3305_s14, 256 }
 0x3a9   :  { %p2795_p0 = scmp.ne.s32.totalorder %s3305_s14, %s2794_s19  ;;  %p2798_p1 = scmp.lt.u32.totalorder %s2794_s19, %s3305_s14 }
 0x3ab   :  { %p2800_p2 = pnand %p2798_p1, %p2795_p0 }
 0x3ad   :  { %2803 = shalt.err (!%p2800_p2)
}
 0x3ae   :  { %1833 = dma.vmem_to_hbm [thread:$0]  %s3235_s30, 256, %s3305_s14, [#allocation20], %s2835_s23, %s2835_s23, %s2836_s24  }
 0x3af   :  { %v1540_v23 = vld [vmem:[%s3302_s11] sm:$0xf] }
 0x3b0   :  { %v1545_v24 = vrot.slane %v1540_v23, %v3199_v19  ;;  %v1553_v25 = vrot.slane %v1540_v23, %v3211_v42  ;;  %v1549_v26 = vrot.slane %v1540_v23, %v3204_v21  ;;  %v1557_v27 = vrot.slane %v1540_v23, %v3208_v32 }
 0x46a   :  { %v1756_v28 = vpop.f32.mrb[16].mxu0  ;;  %v1797_v29 = vpop.f32.mrb[16].mxu1 }
 0x46b   :  { %v1757_v30 = vadd.f32 %v1756_v28, %v1545_v24  ;;  %v1798_v31 = vadd.f32 %v1797_v29, %v1553_v25  ;;  %v1758_v33 = vpop.f32.mrb[17].mxu0  ;;  %v1799_v34 = vpop.f32.mrb[17].mxu1 }
 0x46c   :  { %v1759_v35 = vadd.f32 %v1758_v33, %v1549_v26  ;;  %v1800_v36 = vadd.f32 %v1799_v34, %v1557_v27  ;;  %v1760_v37 = vpop.f32.mrb[18].mxu0  ;;  %v1801_v38 = vpop.f32.mrb[18].mxu1 }
 0x46d   :  { %1804 = vst [vmem:[%s3303_s12] sm:$0xff] %v1757_v30  ;;  %1806 = vst [vmem:[%s3303_s12 + $0x10] sm:$0xff] %v1798_v31  ;;  %v1761_v19 = vpop.f32.mrb[19].mxu0  ;;  %v1802_v21 = vpop.f32.mrb[19].mxu1 }
 0x46e   :  { %1805 = vst [vmem:[%s3303_s12 + $0x8] sm:$0xff] %v1759_v35  ;;  %1807 = vst [vmem:[%s3303_s12 + $0x18] sm:$0xff] %v1800_v36 }
 0x46f   :  { %2830 = dma.done.wait [#allocation6], 256  }
 0x470   :  { %2831 = vsyncadd [#allocation6], 4294967040 }
 0x471   :  { %2832 = dma.done.wait [#allocation20], 256  }
 0x472   :  { %2833 = vsyncadd [#allocation20], 4294967040 }
 0x473   :  { %1842 = vsyncpa [#allocation5], 1 }
 0x474   :  { %1843 = vsyncpa [#allocation10], 1 }
 0x475   :  { %1844 = vsyncpa [#allocation13], 1 }
 0x476   :  { %1845 = vsyncpa [#allocation16], 1 }
 0x477   :  { %1846 = vsyncpa [#allocation6], 1 }
 0x478   :  { %1847 = vsyncpa [#allocation20], 1 }
 0x479   :  { %1848 = vsyncpa [#allocation7], 1 }
 0x47a   :  { %1849 = vsyncmov [#allocation3] }
 0x47d   :  { %s1850_s4 = vpop.sfrf %1849 }
 0x47e   :  { %p2101_p3 = scmp.ne.s32.totalorder %s1850_s4, 0 }
 0x480   :  { %1854 = shalt.err (%p2101_p3)  }
 0x481   :  { %1856 = vsyncmov [#allocation3 + $0x1] }
 0x484   :  { %s1857_s16 = vpop.sfrf %1856 }
 0x485   :  { %p2102_p4 = scmp.ne.s32.totalorder %s1857_s16, 0 }
 0x487   :  { %1861 = shalt.err (%p2102_p4)  }
 0x488   :  { %1863 = vsyncmov [#allocation3 + $0x2] }
 0x48b   :  { %s1864_s12 = vpop.sfrf %1863 }
 0x48c   :  { %p2103_p5 = scmp.ne.s32.totalorder %s1864_s12, 0 }
 0x48e   :  { %1868 = shalt.err (%p2103_p5)  }
 0x48f   :  { %1870 = vsyncmov [#allocation3 + $0x3] }
 0x492   :  { %s1871_s21 = vpop.sfrf %1870 }
 0x493   :  { %p2104_p6 = scmp.ne.s32.totalorder %s1871_s21, 0 }
 0x495   :  { %1875 = shalt.err (%p2104_p6)  }
 0x496   :  { %1877 = vsyncmov [#allocation3 + $0x4] }
 0x499   :  { %s1878_s22 = vpop.sfrf %1877 }
 0x49a   :  { %p2105_p7 = scmp.ne.s32.totalorder %s1878_s22, 0 }
 0x49c   :  { %1882 = shalt.err (%p2105_p7)  }
 0x49d   :  { %1884 = vsyncmov [#allocation3 + $0x5] }
 0x4a0   :  { %s1885_s10 = vpop.sfrf %1884 }
 0x4a1   :  { %p2106_p8 = scmp.ne.s32.totalorder %s1885_s10, 0 }
 0x4a3   :  { %1889 = shalt.err (%p2106_p8)  }
 0x4a4   :  { %1891 = vsyncmov [#allocation3 + $0x6] }
 0x4a7   :  { %s1892_s0 = vpop.sfrf %1891 }
 0x4a8   :  { %p2107_p9 = scmp.ne.s32.totalorder %s1892_s0, 0 }
 0x4aa   :  { %1896 = shalt.err (%p2107_p9)  }
 0x4ab   :  { %1898 = vsyncmov [#allocation3 + $0x7] }
 0x4ae   :  { %s1899_s27 = vpop.sfrf %1898 }
 0x4af   :  { %p2108_p10 = scmp.ne.s32.totalorder %s1899_s27, 0 }
 0x4b1   :  { %1903 = shalt.err (%p2108_p10)  }

</bundles_post_ra>
